<compile_context>
chip_gen: v6e
topology: v6e:2x2x1
jax: 0.10.0
libtpu: 0.0.40
codegen_flags: <defaults>
</compile_context>

<pallas_src>
from functools import partial

import jax
import jax.numpy as jnp
from jax import lax
from jax.experimental import pallas as pl
from jax.experimental.pallas import tpu as pltpu


_VMEM = pl.BlockSpec(memory_space=pltpu.MemorySpace.VMEM)
_SMEM = pl.BlockSpec(memory_space=pltpu.MemorySpace.SMEM)

_LANE = 128
_NEG_BIG = -1e30   # finite "minus infinity" (python float; baked into bias pad)


def _round_up(n, m):
    return ((n + m - 1) // m) * m


# ----------------------------------------------------------------------------
# Fused kernel: `steps` x (forward entropy loss + analytic backward + SGD).
#   inputs : x (B, D), W (D, Kp), b (1, Kp)         [Kp = K padded to 128]
#   outputs: loss (1,1) in SMEM, W_new (D, Kp), b_new (1, Kp)
#            (W_new, b_new aliased onto W, b)
# Returned loss is the one of the LAST step, evaluated at its pre-update
# params — exactly what the PyTorch loop returns.
# ----------------------------------------------------------------------------
def tent_fused_kernel(x_ref, w_ref, b_ref, loss_ref, w_out_ref, b_out_ref,
                      *, steps, lr_over_batch, inv_batch):
    # Params live in the (aliased) output refs for the whole multi-step loop;
    # HBM is touched once on the way in and once on the way out.
    w_out_ref[...] = w_ref[...]                       # (D, Kp) f32
    b_out_ref[...] = b_ref[...]                       # (1, Kp) f32
    x = x_ref[...]                                    # (B, D)  f32, loaded once

    def one_step():
        w = w_out_ref[...]
        b = b_out_ref[...]
        logits = jnp.dot(x, w, preferred_element_type=jnp.float32) + b  # (B, Kp)

        # Numerically stable log_softmax / softmax.  Padded class columns carry
        # a baked-in -1e30 bias, so p underflows to exactly 0 there and no
        # explicit masking (iota / compare / select) is needed below.
        m = jnp.max(logits, axis=1, keepdims=True)
        z = logits - m
        ez = jnp.exp(z)
        se = jnp.sum(ez, axis=1, keepdims=True)
        logp = z - jnp.log(se)                        # log_softmax
        p = jnp.exp(logp)                             # softmax via EUP, no divide

        # Per-sample entropy -(p * logp).sum(1); pad columns contribute exact 0.
        ent = -jnp.sum(p * logp, axis=1, keepdims=True)      # (B, 1)

        # Mean-over-batch loss -> SMEM scalar (last write = last step's loss).
        loss_ref[0, 0] = jnp.sum(ent) * inv_batch

        # d(mean entropy)/dlogits = -p * (log p + H) / B   (1/B folded into lr).
        dl = -p * (logp + ent)                        # (B, Kp); exact 0 in pads

        # dW = x^T @ dl via dot_general contracting over the batch axis so the
        # MXU transposed-LHS path is used (no x transpose through the XLU).
        dw = lax.dot_general(x, dl, (((0,), (0,)), ((), ())),
                             preferred_element_type=jnp.float32)   # (D, Kp)
        db = jnp.sum(dl, axis=0, keepdims=True)       # (1, Kp); exact 0 in pads

        # SGD step, fully in VMEM.
        w_out_ref[...] = w - lr_over_batch * dw
        b_out_ref[...] = b - lr_over_batch * db

    # `steps` is a small static int (Tent default: 1) -> trace-time unroll.
    # TODO(synk): switch to lax.fori_loop for very large step counts.
    for _ in range(steps):
        one_step()


@partial(jax.jit, static_argnames=("lr", "steps"))
def _tent_adapt(x_flat, Wp, bp, *, lr, steps):
    """One fused pallas_call performing all `steps` Tent updates."""
    B, _ = x_flat.shape
    D, Kp = Wp.shape

    loss, W_new, b_new = pl.pallas_call(
        partial(tent_fused_kernel,
                steps=int(steps),
                lr_over_batch=float(lr) / float(B),
                inv_batch=1.0 / float(B)),
        out_shape=(
            jax.ShapeDtypeStruct((1, 1), jnp.float32),
            jax.ShapeDtypeStruct((D, Kp), jnp.float32),
            jax.ShapeDtypeStruct((1, Kp), jnp.float32),
        ),
        in_specs=[_VMEM, _VMEM, _VMEM],
        out_specs=(_SMEM, _VMEM, _VMEM),
        # update W and b in place (inputs 1,2 -> outputs 1,2)
        input_output_aliases={1: 1, 2: 2},
    )(x_flat, Wp, bp)

    return loss[0, 0], W_new, b_new


# ----------------------------------------------------------------------------
# Eval-mode forward: just the (padded) logits matmul.
# ----------------------------------------------------------------------------
def _eval_logits_kernel(x_ref, w_ref, b_ref, o_ref):
    o_ref[...] = (
        jnp.dot(x_ref[...], w_ref[...], preferred_element_type=jnp.float32)
        + b_ref[...]
    )


@jax.jit
def _eval_forward(x_flat, Wp, bp):
    B, _ = x_flat.shape
    Kp = Wp.shape[1]
    return pl.pallas_call(
        _eval_logits_kernel,
        out_shape=jax.ShapeDtypeStruct((B, Kp), jnp.float32),
        in_specs=[_VMEM, _VMEM, _VMEM],
        out_specs=_VMEM,
    )(x_flat, Wp, bp)


# ----------------------------------------------------------------------------
# Tent wrapper (JAX/Pallas port)
# ----------------------------------------------------------------------------
class TentJAX:
    """Tent: entropy-minimizing test-time adaptation of a linear classifier."""

    def __init__(self, W, b, lr=1e-3, steps=1, episodic=False):
        assert steps > 0, "tent requires >= 1 step(s) to forward and update"
        self.K = W.shape[1]
        self.Kp = _round_up(self.K, _LANE)        # lane-dense class dim
        pad = self.Kp - self.K
        Wp = jnp.pad(W.astype(jnp.float32), ((0, 0), (0, pad)))
        bp = jnp.pad(b.astype(jnp.float32), ((0, 0), (0, pad)))
        if pad:
            # Bake a finite "-inf" into the padded bias columns: padded logits
            # become ~-1e30, their softmax prob is exactly 0, their gradient is
            # exactly 0, so the pad is stable across in-place SGD steps and the
            # kernel needs no per-element masking.
            col = jnp.arange(self.Kp)[None, :]
            bp = jnp.where(col < self.K, bp, jnp.float32(_NEG_BIG))
        self.Wp, self.bp = Wp, bp
        self.lr = float(lr)
        self.steps = int(steps)
        self.episodic = episodic
        # copy_model_and_optimizer equivalent (SGD carries no extra state).
        self._Wp0, self._bp0 = self.Wp, self.bp

    def reset(self):
        # load_model_and_optimizer equivalent.
        self.Wp, self.bp = self._Wp0, self._bp0

    # adapted (unpadded) parameters, for inspection
    @property
    def W(self):
        return self.Wp[:, : self.K]

    @property
    def b(self):
        return self.bp[:, : self.K]

    def __call__(self, x_nchw, train=True):
        if self.episodic:
            self.reset()
        B = x_nchw.shape[0]
        x_flat = x_nchw.reshape(B, -1).astype(jnp.float32)
        if train:
            # TODO(synk): reference Tent updates only norm-layer affine params;
            # the synthetic linear model has none, so all params are adapted.
            loss, self.Wp, self.bp = _tent_adapt(
                x_flat, self.Wp, self.bp, lr=self.lr, steps=self.steps)
            return loss
        else:
            # TODO(synk): model.eval() would toggle norm-layer running stats;
            # the synthetic linear model has none, so eval == plain forward.
            return _eval_forward(x_flat, self.Wp, self.bp)[:, : self.K]


# ----------------------------------------------------------------------------
# Main
# ----------------------------------------------------------------------------
if __name__ == "__main__":
    key = jax.random.PRNGKey(0)
    kx, kw, kb = jax.random.split(key, 3)

    # Small shapes consistent with an NCHW image-classifier input.
    B, C, H, W_sp = 8, 4, 16, 16
    D = C * H * W_sp          # 1024
    K = 32                    # number of classes

    x = jax.random.normal(kx, (B, C, H, W_sp), dtype=jnp.float32)
    W0 = jax.random.normal(kw, (D, K), dtype=jnp.float32) * 0.02
    b0 = jax.random.normal(kb, (1, K), dtype=jnp.float32) * 0.01

    tent = TentJAX(W0, b0, lr=1e-3, steps=1, episodic=False)

    # train=True path: fused forward + adapt, returns scalar entropy loss.
    loss = tent(x, train=True)
    loss = jax.block_until_ready(loss)

    # Reference check of the loss against plain JAX (pre-update params).
    x_flat = x.reshape(B, -1)
    logits_ref = x_flat @ W0 + b0
    logp_ref = jax.nn.log_softmax(logits_ref, axis=1)
    loss_ref = jnp.mean(-jnp.sum(jnp.exp(logp_ref) * logp_ref, axis=1))
    assert jnp.allclose(loss, loss_ref, rtol=1e-5, atol=1e-5), (loss, loss_ref)

    # Reference check of the SGD update (analytic grad of mean entropy).
    p_ref = jnp.exp(logp_ref)
    ent_ref = -jnp.sum(p_ref * logp_ref, axis=1, keepdims=True)
    dlog_ref = (-p_ref * (logp_ref + ent_ref)) / B
    W_ref = W0 - 1e-3 * (x_flat.T @ dlog_ref)
    b_ref = b0 - 1e-3 * jnp.sum(dlog_ref, axis=0, keepdims=True)
    assert jnp.allclose(tent.W, W_ref, rtol=1e-4, atol=1e-6)
    assert jnp.allclose(tent.b, b_ref, rtol=1e-4, atol=1e-6)

    # train=False path: returns model outputs with the adapted params.
    outs = tent(x, train=False)
    outs = jax.block_until_ready(outs)
    assert outs.shape == (B, K)
    outs_ref = x_flat @ W_ref + b_ref
    assert jnp.allclose(outs, outs_ref, rtol=1e-4, atol=1e-5)

    print("KERNEL_OK")
</pallas_src>

<mosaic_0001>
module attributes {stable_mosaic.version = 11 : i64} {
  func.func @tent_fused_kernel(%arg0: memref<8x1024xf32, #tpu.memory_space<vmem>>, %arg1: memref<1024x128xf32, #tpu.memory_space<vmem>>, %arg2: memref<1x128xf32, #tpu.memory_space<vmem>>, %arg3: memref<1x1xf32, #tpu.memory_space<smem>>, %arg4: memref<1024x128xf32, #tpu.memory_space<vmem>>, %arg5: memref<1x128xf32, #tpu.memory_space<vmem>>) attributes {dimension_semantics = [], scalar_prefetch = 0 : i64, scratch_operands = 0 : i64, tpu.core_type = #tpu.core_type<tc>} {
    %c0 = arith.constant 0 : index
    %c0_0 = arith.constant 0 : index
    %0 = vector.load %arg1[%c0, %c0_0] : memref<1024x128xf32, #tpu.memory_space<vmem>>, vector<1024x128xf32>
    %c0_1 = arith.constant 0 : index
    %c0_2 = arith.constant 0 : index
    %1 = vector.load %arg4[%c0_1, %c0_2] : memref<1024x128xf32, #tpu.memory_space<vmem>>, vector<1024x128xf32>
    tpu.vector_store %arg4[%c0_1, %c0_2], %0 {strides = array<i32>} : memref<1024x128xf32, #tpu.memory_space<vmem>>, vector<1024x128xf32>,
    %c0_3 = arith.constant 0 : index
    %c0_4 = arith.constant 0 : index
    %2 = vector.load %arg2[%c0_3, %c0_4] : memref<1x128xf32, #tpu.memory_space<vmem>>, vector<1x128xf32>
    %c0_5 = arith.constant 0 : index
    %c0_6 = arith.constant 0 : index
    %3 = vector.load %arg5[%c0_5, %c0_6] : memref<1x128xf32, #tpu.memory_space<vmem>>, vector<1x128xf32>
    tpu.vector_store %arg5[%c0_5, %c0_6], %2 {strides = array<i32>} : memref<1x128xf32, #tpu.memory_space<vmem>>, vector<1x128xf32>,
    %c0_7 = arith.constant 0 : index
    %c0_8 = arith.constant 0 : index
    %4 = vector.load %arg0[%c0_7, %c0_8] : memref<8x1024xf32, #tpu.memory_space<vmem>>, vector<8x1024xf32>
    %c0_9 = arith.constant 0 : index
    %c0_10 = arith.constant 0 : index
    %5 = vector.load %arg4[%c0_9, %c0_10] : memref<1024x128xf32, #tpu.memory_space<vmem>>, vector<1024x128xf32>
    %c0_11 = arith.constant 0 : index
    %c0_12 = arith.constant 0 : index
    %6 = vector.load %arg5[%c0_11, %c0_12] : memref<1x128xf32, #tpu.memory_space<vmem>>, vector<1x128xf32>
    %cst = arith.constant dense<0.000000e+00> : vector<8x128xf32>
    %7 = tpu.matmul %4, %5, %cst {dimension_numbers = #tpu.dot_dimension_numbers<[1], [0], [0], [1], [0, 0, 1, 1], [], []>} : vector<8x1024xf32>, vector<1024x128xf32>, vector<8x128xf32> -> vector<8x128xf32>
    %8 = vector.broadcast %6 : vector<1x128xf32> to vector<8x128xf32>
    %9 = arith.addf %7, %8 : vector<8x128xf32>
    %cst_13 = arith.constant dense<0xFF800000> : vector<8xf32>
    %10 = vector.multi_reduction <maximumf>, %9, %cst_13 [1] : vector<8x128xf32> to vector<8xf32>
    %11 = vector.shape_cast %10 : vector<8xf32> to vector<8x1xf32>
    %12 = vector.broadcast %11 : vector<8x1xf32> to vector<8x128xf32>
    %13 = arith.subf %9, %12 : vector<8x128xf32>
    %14 = math.exp %13 : vector<8x128xf32>
    %cst_14 = arith.constant dense<0.000000e+00> : vector<8xf32>
    %15 = vector.multi_reduction <add>, %14, %cst_14 [1] : vector<8x128xf32> to vector<8xf32>
    %16 = vector.shape_cast %15 : vector<8xf32> to vector<8x1xf32>
    %17 = math.log %16 : vector<8x1xf32>
    %18 = vector.broadcast %17 : vector<8x1xf32> to vector<8x128xf32>
    %19 = arith.subf %13, %18 : vector<8x128xf32>
    %20 = math.exp %19 : vector<8x128xf32>
    %21 = arith.mulf %20, %19 : vector<8x128xf32>
    %cst_15 = arith.constant dense<0.000000e+00> : vector<8xf32>
    %22 = vector.multi_reduction <add>, %21, %cst_15 [1] : vector<8x128xf32> to vector<8xf32>
    %23 = vector.shape_cast %22 : vector<8xf32> to vector<8x1xf32>
    %cst_16 = arith.constant 0.000000e+00 : f32
    %24 = vector.broadcast %cst_16 : f32 to vector<8x1xf32>
    %25 = arith.subf %24, %23 : vector<8x1xf32>
    %26 = vector.shape_cast %25 : vector<8x1xf32> to vector<1x8x1xf32>
    %cst_17 = arith.constant dense<0.000000e+00> : vector<1xf32>
    %27 = vector.multi_reduction <add>, %26, %cst_17 [1, 2] : vector<1x8x1xf32> to vector<1xf32>
    %28 = vector.shape_cast %27 : vector<1xf32> to vector<1x1x1xf32>
    %29 = vector.extract %28[0, 0, 0] : f32 from vector<1x1x1xf32>
    %cst_18 = arith.constant 1.250000e-01 : f32
    %30 = arith.mulf %29, %cst_18 : f32
    %c0_19 = arith.constant 0 : index
    %c0_20 = arith.constant 0 : index
    %31 = memref.load %arg3[%c0_19, %c0_20] : memref<1x1xf32, #tpu.memory_space<smem>>
    memref.store %30, %arg3[%c0_19, %c0_20] : memref<1x1xf32, #tpu.memory_space<smem>>
    %cst_21 = arith.constant 0.000000e+00 : f32
    %32 = vector.broadcast %cst_21 : f32 to vector<8x128xf32>
    %33 = arith.subf %32, %20 : vector<8x128xf32>
    %34 = vector.broadcast %25 : vector<8x1xf32> to vector<8x128xf32>
    %35 = arith.addf %19, %34 : vector<8x128xf32>
    %36 = arith.mulf %33, %35 : vector<8x128xf32>
    %cst_22 = arith.constant dense<0.000000e+00> : vector<1024x128xf32>
    %37 = tpu.matmul %4, %36, %cst_22 {dimension_numbers = #tpu.dot_dimension_numbers<[0], [0], [1], [1], [0, 1, 1, 1], [], []>} : vector<8x1024xf32>, vector<8x128xf32>, vector<1024x128xf32> -> vector<1024x128xf32>
    %cst_23 = arith.constant dense<0.000000e+00> : vector<128xf32>
    %38 = vector.multi_reduction <add>, %36, %cst_23 [0] : vector<8x128xf32> to vector<128xf32>
    %39 = vector.shape_cast %38 : vector<128xf32> to vector<1x128xf32>
    %cst_24 = arith.constant 1.250000e-04 : f32
    %40 = vector.broadcast %cst_24 : f32 to vector<1024x128xf32>
    %41 = arith.mulf %40, %37 : vector<1024x128xf32>
    %42 = arith.subf %5, %41 : vector<1024x128xf32>
    %c0_25 = arith.constant 0 : index
    %c0_26 = arith.constant 0 : index
    %43 = vector.load %arg4[%c0_25, %c0_26] : memref<1024x128xf32, #tpu.memory_space<vmem>>, vector<1024x128xf32>
    tpu.vector_store %arg4[%c0_25, %c0_26], %42 {strides = array<i32>} : memref<1024x128xf32, #tpu.memory_space<vmem>>, vector<1024x128xf32>,
    %cst_27 = arith.constant 1.250000e-04 : f32
    %44 = vector.broadcast %cst_27 : f32 to vector<1x128xf32>
    %45 = arith.mulf %44, %39 : vector<1x128xf32>
    %46 = arith.subf %6, %45 : vector<1x128xf32>
    %c0_28 = arith.constant 0 : index
    %c0_29 = arith.constant 0 : index
    %47 = vector.load %arg5[%c0_28, %c0_29] : memref<1x128xf32, #tpu.memory_space<vmem>>, vector<1x128xf32>
    tpu.vector_store %arg5[%c0_28, %c0_29], %46 {strides = array<i32>} : memref<1x128xf32, #tpu.memory_space<vmem>>, vector<1x128xf32>,
    return
  }
}

</mosaic_0001>

<bundles_post_ra>
// kernel: _tent_adapt.1
= control target key start
LH: loop header
LB: loop body
LE: loop exit
PB: predicated region body
PF: predicated region fallthrough
CT: control target
= control target key end

     0   :  { %s4761_s0 = inlined_call_operand.vmem [shape: f32[8,1024], index: 0, kind: input, shape index: {}]   ;;  %s4762_s1 = inlined_call_operand.vmem [shape: f32[1024,128], index: 1, kind: input, shape index: {}, may-alias: {1,4}]   ;;  %s4763_s2 = inlined_call_operand.vmem [shape: f32[1,128], index: 2, kind: input, shape index: {}, may-alias: {2,5}]   ;;  %s4764_s3 = inlined_call_operand.hbm [shape: f32[1,1], index: 3, kind: output, shape index: {0}]   ;;  %s4765_s4 = inlined_call_operand.vmem [shape: f32[1024,128], index: 4, kind: output, shape index: {1}, may-alias: {1,4}]   ;;  %s4766_s5 = inlined_call_operand.vmem [shape: f32[1,128], index: 5, kind: output, shape index: {2}, may-alias: {2,5}]  }
   0x1   :  { %v49_v0 = vld [vmem:[%s4762_s1 + $0xf8] sm:$0xff]  ;;  %v48_v4 = vld [vmem:[%s4762_s1 + $0xf0] sm:$0xff]  ;;  %v47_v8 = vld [vmem:[%s4762_s1 + $0xe8] sm:$0xff] }
   0x2   :  { %v81_v1 = vld [vmem:[%s4762_s1 + $0x1f8] sm:$0xff]  ;;  %2620 = vmatprep.subr.mxu0 %v49_v0  ;;  %v80_v5 = vld [vmem:[%s4762_s1 + $0x1f0] sm:$0xff]  ;;  %v79_v9 = vld [vmem:[%s4762_s1 + $0x1e8] sm:$0xff] }
   0x3   :  { %v33_v2 = vld [vmem:[%s4762_s1 + $0x78] sm:$0xff]  ;;  %2655 = vmatprep.subr.mxu1 %v81_v1  ;;  %v32_v6 = vld [vmem:[%s4762_s1 + $0x70] sm:$0xff]  ;;  %v31_v10 = vld [vmem:[%s4762_s1 + $0x68] sm:$0xff] }
   0x4   :  { %v65_v3 = vld [vmem:[%s4762_s1 + $0x178] sm:$0xff]  ;;  %2621 = vmatpush3.msra.mxu0 %v33_v2  ;;  %v64_v7 = vld [vmem:[%s4762_s1 + $0x170] sm:$0xff]  ;;  %v63_v11 = vld [vmem:[%s4762_s1 + $0x168] sm:$0xff] }
   0x5   :  { %2656 = vmatpush3.msra.mxu1 %v65_v3  ;;  %2622 = vmatprep.subr.mxu0 %v48_v4  ;;  %v46_v12 = vld [vmem:[%s4762_s1 + $0xe0] sm:$0xff]  ;;  %v45_v16 = vld [vmem:[%s4762_s1 + $0xd8] sm:$0xff]  ;;  %v44_v20 = vld [vmem:[%s4762_s1 + $0xd0] sm:$0xff] }
   0x6   :  { %2657 = vmatprep.subr.mxu1 %v80_v5  ;;  %2623 = vmatpush3.msra.mxu0 %v32_v6  ;;  %v78_v13 = vld [vmem:[%s4762_s1 + $0x1e0] sm:$0xff]  ;;  %v77_v17 = vld [vmem:[%s4762_s1 + $0x1d8] sm:$0xff]  ;;  %v76_v21 = vld [vmem:[%s4762_s1 + $0x1d0] sm:$0xff] }
   0x7   :  { %2658 = vmatpush3.msra.mxu1 %v64_v7  ;;  %2624 = vmatprep.subr.mxu0 %v47_v8  ;;  %v30_v14 = vld [vmem:[%s4762_s1 + $0x60] sm:$0xff]  ;;  %v29_v18 = vld [vmem:[%s4762_s1 + $0x58] sm:$0xff]  ;;  %v28_v22 = vld [vmem:[%s4762_s1 + $0x50] sm:$0xff] }
   0x8   :  { %2659 = vmatprep.subr.mxu1 %v79_v9  ;;  %v62_v15 = vld [vmem:[%s4762_s1 + $0x160] sm:$0xff]  ;;  %2625 = vmatpush3.msra.mxu0 %v31_v10  ;;  %v61_v19 = vld [vmem:[%s4762_s1 + $0x158] sm:$0xff]  ;;  %v60_v23 = vld [vmem:[%s4762_s1 + $0x150] sm:$0xff] }
   0x9   :  { %2660 = vmatpush3.msra.mxu1 %v63_v11  ;;  %2626 = vmatprep.subr.mxu0 %v46_v12  ;;  %v43_v24 = vld [vmem:[%s4762_s1 + $0xc8] sm:$0xff]  ;;  %v42_v28 = vld [vmem:[%s4762_s1 + $0xc0] sm:$0xff]  ;;  %v41_v32 = vld [vmem:[%s4762_s1 + $0xb8] sm:$0xff] }
   0xa   :  { %2661 = vmatprep.subr.mxu1 %v78_v13  ;;  %2627 = vmatpush3.msra.mxu0 %v30_v14  ;;  %v75_v25 = vld [vmem:[%s4762_s1 + $0x1c8] sm:$0xff]  ;;  %v74_v29 = vld [vmem:[%s4762_s1 + $0x1c0] sm:$0xff]  ;;  %v73_v33 = vld [vmem:[%s4762_s1 + $0x1b8] sm:$0xff] }
   0xb   :  { %2662 = vmatpush3.msra.mxu1 %v62_v15  ;;  %2628 = vmatprep.subr.mxu0 %v45_v16  ;;  %v27_v26 = vld [vmem:[%s4762_s1 + $0x48] sm:$0xff]  ;;  %v26_v30 = vld [vmem:[%s4762_s1 + $0x40] sm:$0xff]  ;;  %v25_v34 = vld [vmem:[%s4762_s1 + $0x38] sm:$0xff] }
   0xc   :  { %2663 = vmatprep.subr.mxu1 %v77_v17  ;;  %2629 = vmatpush3.msra.mxu0 %v29_v18  ;;  %v59_v27 = vld [vmem:[%s4762_s1 + $0x148] sm:$0xff]  ;;  %v58_v31 = vld [vmem:[%s4762_s1 + $0x140] sm:$0xff]  ;;  %v57_v35 = vld [vmem:[%s4762_s1 + $0x138] sm:$0xff] }
   0xd   :  { %2664 = vmatpush3.msra.mxu1 %v61_v19  ;;  %2630 = vmatprep.subr.mxu0 %v44_v20  ;;  %v40_v36 = vld [vmem:[%s4762_s1 + $0xb0] sm:$0xff]  ;;  %v39_v40 = vld [vmem:[%s4762_s1 + $0xa8] sm:$0xff]  ;;  %v38_v44 = vld [vmem:[%s4762_s1 + $0xa0] sm:$0xff] }
   0xe   :  { %2665 = vmatprep.subr.mxu1 %v76_v21  ;;  %2631 = vmatpush3.msra.mxu0 %v28_v22  ;;  %v72_v37 = vld [vmem:[%s4762_s1 + $0x1b0] sm:$0xff]  ;;  %v71_v41 = vld [vmem:[%s4762_s1 + $0x1a8] sm:$0xff]  ;;  %v70_v45 = vld [vmem:[%s4762_s1 + $0x1a0] sm:$0xff] }
   0xf   :  { %2666 = vmatpush3.msra.mxu1 %v60_v23  ;;  %2632 = vmatprep.subr.mxu0 %v43_v24  ;;  %v24_v38 = vld [vmem:[%s4762_s1 + $0x30] sm:$0xff]  ;;  %v23_v42 = vld [vmem:[%s4762_s1 + $0x28] sm:$0xff]  ;;  %v22_v46 = vld [vmem:[%s4762_s1 + $0x20] sm:$0xff] }
  0x10   :  { %2667 = vmatprep.subr.mxu1 %v75_v25  ;;  %2633 = vmatpush3.msra.mxu0 %v27_v26  ;;  %v56_v39 = vld [vmem:[%s4762_s1 + $0x130] sm:$0xff]  ;;  %v55_v43 = vld [vmem:[%s4762_s1 + $0x128] sm:$0xff]  ;;  %v54_v47 = vld [vmem:[%s4762_s1 + $0x120] sm:$0xff] }
  0x11   :  { %2668 = vmatpush3.msra.mxu1 %v59_v27  ;;  %2634 = vmatprep.subr.mxu0 %v42_v28  ;;  %v37_v48 = vld [vmem:[%s4762_s1 + $0x98] sm:$0xff]  ;;  %v36_v52 = vld [vmem:[%s4762_s1 + $0x90] sm:$0xff]  ;;  %v35_v56 = vld [vmem:[%s4762_s1 + $0x88] sm:$0xff] }
  0x12   :  { %2669 = vmatprep.subr.mxu1 %v74_v29  ;;  %2635 = vmatpush3.msra.mxu0 %v26_v30  ;;  %v69_v49 = vld [vmem:[%s4762_s1 + $0x198] sm:$0xff]  ;;  %v68_v53 = vld [vmem:[%s4762_s1 + $0x190] sm:$0xff]  ;;  %v67_v57 = vld [vmem:[%s4762_s1 + $0x188] sm:$0xff] }
  0x13   :  { %2670 = vmatpush3.msra.mxu1 %v58_v31  ;;  %2636 = vmatprep.subr.mxu0 %v41_v32  ;;  %v21_v50 = vld [vmem:[%s4762_s1 + $0x18] sm:$0xff]  ;;  %v20_v54 = vld [vmem:[%s4762_s1 + $0x10] sm:$0xff]  ;;  %v3427_v58 = vld [vmem:[%s4762_s1 + $0x8] sm:$0xff] }
  0x14   :  { %2671 = vmatprep.subr.mxu1 %v73_v33  ;;  %2637 = vmatpush3.msra.mxu0 %v25_v34  ;;  %v53_v51 = vld [vmem:[%s4762_s1 + $0x118] sm:$0xff]  ;;  %v52_v55 = vld [vmem:[%s4762_s1 + $0x110] sm:$0xff]  ;;  %v51_v59 = vld [vmem:[%s4762_s1 + $0x108] sm:$0xff] }
  0x15   :  { %2672 = vmatpush3.msra.mxu1 %v57_v35  ;;  %2638 = vmatprep.subr.mxu0 %v40_v36  ;;  %v34_v60 = vld [vmem:[%s4762_s1 + $0x80] sm:$0xff]  ;;  %v3446_v63 = vld [vmem:[%s4761_s0 + $0x8] sm:$0xff]  ;;  %v3460_v2 = vld [vmem:[%s4761_s0 + $0x18] sm:$0xff] }
  0x16   :  { %2673 = vmatprep.subr.mxu1 %v72_v37  ;;  %2639 = vmatpush3.msra.mxu0 %v24_v38  ;;  %v66_v61 = vld [vmem:[%s4762_s1 + $0x180] sm:$0xff]  ;;  %v113_v3 = vld [vmem:[%s4762_s1 + $0x2f8] sm:$0xff]  ;;  %v3473_v5 = vld [vmem:[%s4761_s0 + $0x10] sm:$0xff] }
  0x17   :  { %2674 = vmatpush3.msra.mxu1 %v56_v39  ;;  %2640 = vmatprep.subr.mxu0 %v39_v40  ;;  %v3441_v62 = vld [vmem:[%s4762_s1] sm:$0xff]  ;;  %v145_v4 = vld [vmem:[%s4762_s1 + $0x3f8] sm:$0xff]  ;;  %v112_v8 = vld [vmem:[%s4762_s1 + $0x2f0] sm:$0xff] }
  0x18   :  { %2675 = vmatprep.subr.mxu1 %v71_v41  ;;  %2641 = vmatpush3.msra.mxu0 %v23_v42  ;;  %4780 = vst [vmem:[#allocation5_spill] sm:$0xff] %v3441_v62  ;;  %v50_v0 = vld [vmem:[%s4762_s1 + $0x100] sm:$0xff]  ;;  %v97_v6 = vld [vmem:[%s4762_s1 + $0x278] sm:$0xff]  ;;  %v144_v9 = vld [vmem:[%s4762_s1 + $0x3f0] sm:$0xff] }
  0x19   :  { %2676 = vmatpush3.msra.mxu1 %v55_v43  ;;  %2642 = vmatprep.subr.mxu0 %v38_v44  ;;  %v3455_v1 = vld [vmem:[%s4761_s0] sm:$0xff]  ;;  %v129_v7 = vld [vmem:[%s4762_s1 + $0x378] sm:$0xff]  ;;  %v96_v10 = vld [vmem:[%s4762_s1 + $0x270] sm:$0xff] }
  0x1a   :  { %2677 = vmatprep.subr.mxu1 %v70_v45  ;;  %2643 = vmatpush3.msra.mxu0 %v22_v46  ;;  %v128_v11 = vld [vmem:[%s4762_s1 + $0x370] sm:$0xff]  ;;  %v111_v12 = vld [vmem:[%s4762_s1 + $0x2e8] sm:$0xff]  ;;  %v110_v16 = vld [vmem:[%s4762_s1 + $0x2e0] sm:$0xff] }
  0x1b   :  { %2678 = vmatpush3.msra.mxu1 %v54_v47  ;;  %2644 = vmatprep.subr.mxu0 %v37_v48  ;;  %v143_v13 = vld [vmem:[%s4762_s1 + $0x3e8] sm:$0xff]  ;;  %v142_v17 = vld [vmem:[%s4762_s1 + $0x3e0] sm:$0xff]  ;;  %v109_v20 = vld [vmem:[%s4762_s1 + $0x2d8] sm:$0xff] }
  0x1c   :  { %2679 = vmatprep.subr.mxu1 %v69_v49  ;;  %2645 = vmatpush3.msra.mxu0 %v21_v50  ;;  %v95_v14 = vld [vmem:[%s4762_s1 + $0x268] sm:$0xff]  ;;  %v94_v18 = vld [vmem:[%s4762_s1 + $0x260] sm:$0xff]  ;;  %v141_v21 = vld [vmem:[%s4762_s1 + $0x3d8] sm:$0xff] }
  0x1d   :  { %2680 = vmatpush3.msra.mxu1 %v53_v51  ;;  %2646 = vmatprep.subr.mxu0 %v36_v52  ;;  %v127_v15 = vld [vmem:[%s4762_s1 + $0x368] sm:$0xff]  ;;  %v126_v19 = vld [vmem:[%s4762_s1 + $0x360] sm:$0xff]  ;;  %v93_v22 = vld [vmem:[%s4762_s1 + $0x258] sm:$0xff] }
  0x1e   :  { %2681 = vmatprep.subr.mxu1 %v68_v53  ;;  %2647 = vmatpush3.msra.mxu0 %v20_v54  ;;  %v125_v23 = vld [vmem:[%s4762_s1 + $0x358] sm:$0xff]  ;;  %v108_v24 = vld [vmem:[%s4762_s1 + $0x2d0] sm:$0xff]  ;;  %v107_v28 = vld [vmem:[%s4762_s1 + $0x2c8] sm:$0xff] }
  0x1f   :  { %2682 = vmatpush3.msra.mxu1 %v52_v55  ;;  %2648 = vmatprep.subr.mxu0 %v35_v56  ;;  %v140_v25 = vld [vmem:[%s4762_s1 + $0x3d0] sm:$0xff]  ;;  %v139_v29 = vld [vmem:[%s4762_s1 + $0x3c8] sm:$0xff] }
  0x20   :  { %2683 = vmatprep.subr.mxu1 %v67_v57  ;;  %2649 = vmatpush3.msra.mxu0 %v3427_v58  ;;  %v92_v26 = vld [vmem:[%s4762_s1 + $0x250] sm:$0xff]  ;;  %v3553_v30 = vld [vmem:[%s4762_s1 + $0x248] sm:$0xff] }
  0x21   :  { %2684 = vmatpush3.msra.mxu1 %v51_v59  ;;  %2650 = vmatprep.subr.mxu0 %v34_v60  ;;  %v124_v27 = vld [vmem:[%s4762_s1 + $0x350] sm:$0xff]  ;;  %4781 = vst [vmem:[#allocation6_spill] sm:$0xff] %v3553_v30  ;;  %v123_v31 = vld [vmem:[%s4762_s1 + $0x348] sm:$0xff] }
  0x22   :  { %2685 = vmatprep.subr.mxu1 %v66_v61  ;;  %2651 = vmatpush3.msra.mxu0 %v3441_v62 }
  0x23   :  { %483 = vmatprep.mubr.f32.mxu0 %v3446_v63  ;;  %2686 = vmatpush3.msra.mxu1 %v50_v0 }
  0x24   :  { %484 = vmatmul.mubr.f32.vlgmr.msra.gmra.mxu0 %v3455_v1  ;;  %553 = vmatprep.mubr.f32.mxu1 %v3460_v2 }
  0x25   :  { %2690 = vmatprep.subr.mxu0 %v113_v3  ;;  %2725 = vmatprep.subr.mxu1 %v145_v4 }
  0x26   :  { %554 = vmatmul.mubr.f32.vlgmr.msra.gmra.mxu1 %v3473_v5  ;;  %2691 = vmatpush3.msra.mxu0 %v97_v6 }
  0x27   :  { %2726 = vmatpush3.msra.mxu1 %v129_v7  ;;  %2692 = vmatprep.subr.mxu0 %v112_v8 }
  0x28   :  { %2727 = vmatprep.subr.mxu1 %v144_v9  ;;  %2693 = vmatpush3.msra.mxu0 %v96_v10 }
  0x29   :  { %2728 = vmatpush3.msra.mxu1 %v128_v11  ;;  %2694 = vmatprep.subr.mxu0 %v111_v12 }
  0x2a   :  { %2729 = vmatprep.subr.mxu1 %v143_v13  ;;  %2695 = vmatpush3.msra.mxu0 %v95_v14 }
  0x2b   :  { %2730 = vmatpush3.msra.mxu1 %v127_v15  ;;  %2696 = vmatprep.subr.mxu0 %v110_v16 }
  0x2c   :  { %2731 = vmatprep.subr.mxu1 %v142_v17  ;;  %2697 = vmatpush3.msra.mxu0 %v94_v18 }
  0x2d   :  { %2732 = vmatpush3.msra.mxu1 %v126_v19  ;;  %2698 = vmatprep.subr.mxu0 %v109_v20 }
  0x2e   :  { %2733 = vmatprep.subr.mxu1 %v141_v21  ;;  %2699 = vmatpush3.msra.mxu0 %v93_v22 }
  0x2f   :  { %2734 = vmatpush3.msra.mxu1 %v125_v23  ;;  %2700 = vmatprep.subr.mxu0 %v108_v24 }
  0x30   :  { %2735 = vmatprep.subr.mxu1 %v140_v25 }
  0x31   :  { %11 = vsyncpa [#allocation3], 0  ;;  %2701 = vmatpush3.msra.mxu0 %v92_v26  ;;  %2736 = vmatpush3.msra.mxu1 %v124_v27  ;;  %v106_v32 = vld [vmem:[%s4762_s1 + $0x2c0] sm:$0xff]  ;;  %v105_v36 = vld [vmem:[%s4762_s1 + $0x2b8] sm:$0xff]  ;;  %v414_v15 = vlaneseq  ;;  %vm988_vm0 = vcmask 64512   ;;  %vm715_vm1 = vcmask 7168  }
  0x32   :  { %v138_v33 = vld [vmem:[%s4762_s1 + $0x3c0] sm:$0xff]  ;;  %2702 = vmatprep.subr.mxu0 %v107_v28  ;;  %2737 = vmatprep.subr.mxu1 %v139_v29  ;;  %v137_v37 = vld [vmem:[%s4762_s1 + $0x3b8] sm:$0xff]  ;;  %v104_v40 = vld [vmem:[%s4762_s1 + $0x2b0] sm:$0xff]  ;;  %s3219_s7 = smov [#allocation2]  }
  0x33   :  { %v3567_v34 = vld [vmem:[%s4762_s1 + $0x240] sm:$0xff]  ;;  %2703 = vmatpush3.msra.mxu0 %v3553_v30  ;;  %2738 = vmatpush3.msra.mxu1 %v123_v31  ;;  %v3582_v38 = vld [vmem:[%s4762_s1 + $0x238] sm:$0xff]  ;;  %v136_v41 = vld [vmem:[%s4762_s1 + $0x3b0] sm:$0xff]  ;;  %v415_v16 = vshrl.u32 %v414_v15, 7 }
  0x34   :  { %4782 = vst [vmem:[#allocation7_spill] sm:$0xff] %v3567_v34  ;;  %v122_v35 = vld [vmem:[%s4762_s1 + $0x340] sm:$0xff]  ;;  %2704 = vmatprep.subr.mxu0 %v106_v32  ;;  %2739 = vmatprep.subr.mxu1 %v138_v33  ;;  %4783 = vst [vmem:[#allocation8_spill] sm:$0xff] %v3582_v38  ;;  %v121_v39 = vld [vmem:[%s4762_s1 + $0x338] sm:$0xff] }
  0x35   :  { %2705 = vmatpush3.msra.mxu0 %v3567_v34  ;;  %2740 = vmatpush3.msra.mxu1 %v122_v35  ;;  %v3597_v42 = vld [vmem:[%s4762_s1 + $0x230] sm:$0xff]  ;;  %v103_v44 = vld [vmem:[%s4762_s1 + $0x2a8] sm:$0xff]  ;;  %v102_v48 = vld [vmem:[%s4762_s1 + $0x2a0] sm:$0xff]  ;;  %v416_v18 = vsub.s32 0, %v415_v16 }
  0x36   :  { %2706 = vmatprep.subr.mxu0 %v105_v36  ;;  %2741 = vmatprep.subr.mxu1 %v137_v37  ;;  %4784 = vst [vmem:[#allocation9_spill] sm:$0xff] %v3597_v42  ;;  %v120_v43 = vld [vmem:[%s4762_s1 + $0x330] sm:$0xff]  ;;  %v135_v45 = vld [vmem:[%s4762_s1 + $0x3a8] sm:$0xff]  ;;  %v134_v49 = vld [vmem:[%s4762_s1 + $0x3a0] sm:$0xff] }
  0x37   :  { %2707 = vmatpush3.msra.mxu0 %v3582_v38  ;;  %2742 = vmatpush3.msra.mxu1 %v121_v39  ;;  %v3612_v46 = vld [vmem:[%s4762_s1 + $0x228] sm:$0xff]  ;;  %v3627_v50 = vld [vmem:[%s4762_s1 + $0x220] sm:$0xff]  ;;  %v101_v52 = vld [vmem:[%s4762_s1 + $0x298] sm:$0xff] }
  0x38   :  { %2708 = vmatprep.subr.mxu0 %v104_v40  ;;  %2743 = vmatprep.subr.mxu1 %v136_v41  ;;  %4785 = vst [vmem:[#allocation10_spill] sm:$0xff] %v3612_v46  ;;  %v119_v47 = vld [vmem:[%s4762_s1 + $0x328] sm:$0xff]  ;;  %4786 = vst [vmem:[#allocation11_spill] sm:$0xff] %v3627_v50  ;;  %v118_v51 = vld [vmem:[%s4762_s1 + $0x320] sm:$0xff] }
  0x39   :  { %2709 = vmatpush3.msra.mxu0 %v3597_v42  ;;  %2744 = vmatpush3.msra.mxu1 %v120_v43  ;;  %v133_v53 = vld [vmem:[%s4762_s1 + $0x398] sm:$0xff]  ;;  %v100_v56 = vld [vmem:[%s4762_s1 + $0x290] sm:$0xff]  ;;  %v3666_v61 = vld [vmem:[%s4762_s1 + $0x288] sm:$0xff] }
  0x3a   :  { %2710 = vmatprep.subr.mxu0 %v103_v44  ;;  %2745 = vmatprep.subr.mxu1 %v135_v45  ;;  %v3642_v54 = vld [vmem:[%s4762_s1 + $0x218] sm:$0xff]  ;;  %v132_v57 = vld [vmem:[%s4762_s1 + $0x390] sm:$0xff]  ;;  %4789 = vst [vmem:[#allocation14_spill] sm:$0xff] %v3666_v61  ;;  %v131_v0 = vld [vmem:[%s4762_s1 + $0x388] sm:$0xff] }
  0x3b   :  { %2711 = vmatpush3.msra.mxu0 %v3612_v46  ;;  %2746 = vmatpush3.msra.mxu1 %v119_v47  ;;  %4787 = vst [vmem:[#allocation12_spill] sm:$0xff] %v3642_v54  ;;  %v117_v55 = vld [vmem:[%s4762_s1 + $0x318] sm:$0xff]  ;;  %v3657_v59 = vld [vmem:[%s4762_s1 + $0x210] sm:$0xff]  ;;  %v3674_v3 = vld [vmem:[%s4762_s1 + $0x208] sm:$0xff] }
  0x3c   :  { %2712 = vmatprep.subr.mxu0 %v102_v48  ;;  %2747 = vmatprep.subr.mxu1 %v134_v49  ;;  %4788 = vst [vmem:[#allocation13_spill] sm:$0xff] %v3657_v59  ;;  %v116_v60 = vld [vmem:[%s4762_s1 + $0x310] sm:$0xff]  ;;  %4790 = vst [vmem:[#allocation15_spill] sm:$0xff] %v3674_v3  ;;  %v115_v4 = vld [vmem:[%s4762_s1 + $0x308] sm:$0xff] }
  0x3d   :  { %2713 = vmatpush3.msra.mxu0 %v3627_v50  ;;  %2748 = vmatpush3.msra.mxu1 %v118_v51  ;;  %v3683_v6 = vld [vmem:[%s4762_s1 + $0x280] sm:$0xff]  ;;  %v3697_v9 = vld [vmem:[%s4761_s0 + $0x28] sm:$0xff]  ;;  %v3706_v11 = vld [vmem:[%s4761_s0 + $0x38] sm:$0xff] }
  0x3e   :  { %2714 = vmatprep.subr.mxu0 %v101_v52  ;;  %2749 = vmatprep.subr.mxu1 %v133_v53  ;;  %4791 = vst [vmem:[#allocation16_spill] sm:$0xff] %v3683_v6  ;;  %v130_v7 = vld [vmem:[%s4762_s1 + $0x380] sm:$0xff]  ;;  %v3715_v13 = vld [vmem:[%s4761_s0 + $0x30] sm:$0xff] }
  0x3f   :  { %2715 = vmatpush3.msra.mxu0 %v3642_v54  ;;  %2750 = vmatpush3.msra.mxu1 %v117_v55  ;;  %v3692_v8 = vld [vmem:[%s4762_s1 + $0x200] sm:$0xff] }
  0x40   :  { %2716 = vmatprep.subr.mxu0 %v100_v56  ;;  %2751 = vmatprep.subr.mxu1 %v132_v57  ;;  %4792 = vst [vmem:[#allocation17_spill] sm:$0xff] %v3692_v8  ;;  %v114_v10 = vld [vmem:[%s4762_s1 + $0x300] sm:$0xff] }
  0x41   :  { %2717 = vmatpush3.msra.mxu0 %v3657_v59  ;;  %2752 = vmatpush3.msra.mxu1 %v116_v60  ;;  %v280_v12 = vld [vmem:[%s4761_s0 + $0x20] sm:$0xff] }
  0x42   :  { %2718 = vmatprep.subr.mxu0 %v3666_v61  ;;  %2753 = vmatprep.subr.mxu1 %v131_v0  ;;  %v274_v14 = vld [vmem:[%s4763_s2] sm:$0x1] }
  0x43   :  { %2719 = vmatpush3.msra.mxu0 %v3674_v3  ;;  %2754 = vmatpush3.msra.mxu1 %v115_v4  ;;  %275 = vst [vmem:[%s4766_s5] sm:$0x1] %v274_v14 }
  0x44   :  { %2720 = vmatprep.subr.mxu0 %v3683_v6  ;;  %2755 = vmatprep.subr.mxu1 %v130_v7 }
  0x45   :  { %2721 = vmatpush3.msra.mxu0 %v3692_v8  ;;  %623 = vmatprep.mubr.f32.mxu0 %v3697_v9 }
  0x46   :  { %2756 = vmatpush3.msra.mxu1 %v114_v10  ;;  %693 = vmatprep.mubr.f32.mxu1 %v3706_v11 }
  0x47   :  { %624 = vmatmul.mubr.f32.vlgmr.msra.gmra.mxu0 %v280_v12  ;;  %694 = vmatmul.mubr.f32.vlgmr.msra.gmra.mxu1 %v3715_v13 }
  0x48   :  { %732 = vxpose.xlu1.b32.start.end [1/1] (short) %v3455_v1, 128 }
  0x4a   :  { %v3731_v20 = vld [vmem:[%s4766_s5] sm:$0x1] }
  0x4b   :  { %v417_v1 = vrot.slane %v3731_v20, %v416_v18 }
  0xc4   :  { %v748_v43 = vpop.trf.xlu1 }
  0xc5   :  { %2891 = vmatprep.mubr.msk.f32.mxu0 %vm988_vm0, %v748_v43 }
  0xc8   :  { %v749_v16 = vpop.trf.xlu1 }
  0xcc   :  { %v750_v18 = vpop.trf.xlu1 }
  0xe4   :  { %v2652_v17 = vpop.f32.mrf.mxu0 }
  0xe6   :  { %v2687_v19 = vpop.f32.mrf.mxu1  ;;  %v2653_v21 = vpop.f32.mrf.mxu0 }
  0xe7   :  { %v2654_v22 = vadd.f32 %v2653_v21, %v2652_v17  ;;  %v751_v21 = vpop.trf.xlu1 }
  0xe8   :  { %v2688_v23 = vpop.f32.mrf.mxu1 }
  0xe9   :  { %v486_v24 = vadd.f32 %v2654_v22, %v417_v1  ;;  %v2689_v25 = vadd.f32 %v2688_v23, %v2687_v19 }
  0xeb   :  { %v556_v31 = vadd.f32 %v2689_v25, %v486_v24  ;;  %v752_v23 = vpop.trf.xlu1 }
  0xef   :  { %v753_v25 = vpop.trf.xlu1 }
 0x107   :  { %v2722_v26 = vpop.f32.mrf.mxu0  ;;  %v2757_v27 = vpop.f32.mrf.mxu1 }
 0x109   :  { %v2723_v28 = vpop.f32.mrf.mxu0  ;;  %v2758_v29 = vpop.f32.mrf.mxu1 }
 0x10a   :  { %v2724_v32 = vadd.f32 %v2723_v28, %v2722_v26  ;;  %v2759_v35 = vadd.f32 %v2758_v29, %v2757_v27 }
 0x10c   :  { %v626_v33 = vadd.f32 %v2724_v32, %v556_v31 }
 0x10e   :  { %v696_v36 = vadd.f32 %v2759_v35, %v626_v33 }
 0x110   :  { %699 = vmax.xlane.f32.xlu0 %v696_v36 }
 0x199   :  { %v700_v37 = vpop.xlane.xlu0 %699 }
 0x19a   :  { %v701_v39 = vsub.f32 %v696_v36, %v700_v37 }
 0x19c   :  { %v702_v40 = vmul.f32 1.442695, %v701_v39 }
 0x19e   :  { %3089 = vpow2.f32 %v702_v40 }
 0x1ab   :  { %v3090_v41 = vpop.eup %3089 }
 0x1ac   :  { %704 = vadd.xlane.f32.xlu0 %v3090_v41 }
 0x1d9   :  { %860 = vxpose.xlu0.b32.start.end [1/1] (short) %v280_v12, 128 }
 0x216   :  { %764 = vxpose.xlu0.b32.start.end [1/1] (short) %v3446_v63, 128 }
 0x235   :  { %v705_v44 = vpop.xlane.xlu0 %704 }
 0x236   :  { %3091 = vlog2.f32 %v705_v44 }
 0x243   :  { %v3092_v45 = vpop.eup %3091 }
 0x244   :  { %v707_v47 = vmul.f32 0.6931472, %v3092_v45 }
 0x246   :  { %v3736_v48 = vsub.f32 %v701_v39, %v707_v47 }
 0x248   :  { %v709_v49 = vmul.f32 1.442695, %v3736_v48 }
 0x24a   :  { %3093 = vpow2.f32 %v709_v49 }
 0x253   :  { %796 = vxpose.xlu0.b32.start.end [1/1] (short) %v3473_v5, 128 }
 0x255   :  { %v876_v51 = vpop.trf.xlu0 }
 0x256   :  { %2987 = vmatprep.mubr.msk.f32.mxu1 %vm988_vm0, %v876_v51 }
 0x257   :  { %v3094_v52 = vpop.eup %3093 }
 0x258   :  { %v711_v53 = vmul.f32 %v3094_v52, %v3736_v48 }
 0x259   :  { %v3742_v63 = vpop.trf.xlu0 }
 0x25a   :  { %712 = vadd.xlane.f32.xlu1 %v711_v53 }
 0x25d   :  { %v3744_v55 = vpop.trf.xlu0 }
 0x261   :  { %v3746_v56 = vpop.trf.xlu0 }
 0x265   :  { %v3748_v57 = vpop.trf.xlu0 }
 0x269   :  { %v3750_v60 = vpop.trf.xlu0 }
 0x26d   :  { %v3752_v0 = vpop.trf.xlu0 }
 0x271   :  { %v3754_v5 = vpop.trf.xlu0 }
 0x275   :  { %v3756_v4 = vpop.trf.xlu0 }
 0x279   :  { %v3758_v7 = vpop.trf.xlu0 }
 0x27d   :  { %v3760_v10 = vpop.trf.xlu0 }
 0x281   :  { %v3762_v12 = vpop.trf.xlu0 }
 0x285   :  { %v3764_v14 = vpop.trf.xlu0 }
 0x289   :  { %v3766_v15 = vpop.trf.xlu0 }
 0x28d   :  { %892 = vxpose.xlu1.b32.start.end [1/1] (short) %v3697_v9, 128  ;;  %v3769_v17 = vpop.trf.xlu0  ;;  %v754_v9 = vpop.trf.xlu1 }
 0x290   :  { %828 = vxpose.xlu0.b32.start.end [1/1] (short) %v3460_v2, 128 }
 0x291   :  { %v3772_v19 = vpop.trf.xlu0  ;;  %v755_v29 = vpop.trf.xlu1 }
 0x295   :  { %v3774_v1 = vpop.trf.xlu0  ;;  %v756_v32 = vpop.trf.xlu1 }
 0x299   :  { %v3776_v22 = vpop.trf.xlu0  ;;  %v757_v35 = vpop.trf.xlu1 }
 0x29d   :  { %v3778_v24 = vpop.trf.xlu0  ;;  %v758_v39 = vpop.trf.xlu1 }
 0x2a1   :  { %v3780_v26 = vpop.trf.xlu0  ;;  %v759_v41 = vpop.trf.xlu1 }
 0x2a5   :  { %v3782_v27 = vpop.trf.xlu0  ;;  %v760_v45 = vpop.trf.xlu1 }
 0x2a9   :  { %v3784_v28 = vpop.trf.xlu0  ;;  %v761_v49 = vpop.trf.xlu1 }
 0x2ad   :  { %v3786_v2 = vpop.trf.xlu0  ;;  %v762_v6 = vpop.trf.xlu1 }
 0x2b1   :  { %v3788_v31 = vpop.trf.xlu0  ;;  %v763_v34 = vpop.trf.xlu1 }
 0x2b5   :  { %v3790_v33 = vpop.trf.xlu0 }
 0x2b9   :  { %v3792_v36 = vpop.trf.xlu0 }
 0x2bd   :  { %v3794_v37 = vpop.trf.xlu0 }
 0x2c1   :  { %v3796_v40 = vpop.trf.xlu0 }
 0x2c5   :  { %v3798_v43 = vpop.trf.xlu0 }
 0x2c9   :  { %v3800_v44 = vpop.trf.xlu0 }
 0x2ca   :  { %924 = vxpose.xlu1.b32.start.end [1/1] (short) %v3715_v13, 128  ;;  %v729_v13 = vsub.f32 0.0, %v3094_v52 }
 0x2cd   :  { %v3803_v47 = vpop.trf.xlu0 }
 0x2d1   :  { %v3805_v51 = vpop.trf.xlu0 }
 0x2d5   :  { %v3807_v53 = vpop.trf.xlu0 }
 0x2d9   :  { %v3809_v61 = vpop.trf.xlu0 }
 0x2dd   :  { %v3811_v30 = vpop.trf.xlu0 }
 0x2e1   :  { %v3813_v42 = vpop.trf.xlu0 }
 0x2e3   :  { %v713_v38 = vpop.xlane.xlu1 %712 }
 0x2e4   :  { %v714_v50 = vsub.f32 0.0, %v713_v38 }
 0x2e5   :  { %v3815_v46 = vpop.trf.xlu0 }
 0x2e6   :  { %v730_v59 = vadd.f32 %v714_v50, %v3736_v48 }
 0x2e8   :  { %v731_v54 = vmul.f32 %v730_v59, %v729_v13 }
 0x2e9   :  { %v3818_v8 = vpop.trf.xlu0 }
 0x2ea   :  { %v2078_v62 = vrot.slane %v731_v54, 4  ;;  %2889 = vmatprep.subr.mxu0 %v731_v54  ;;  %3083 = vmatprep.subr.mxu1 %v731_v54 }
 0x2eb   :  { %2890 = vmatpush3.msra.mxu0 %v731_v54  ;;  %3084 = vmatpush3.msra.mxu1 %v731_v54 }
 0x2ec   :  { %v2079_v3 = vadd.f32 %v2078_v62, %v731_v54  ;;  %2892 = vmatmul.mubr.msk.f32.vlgmr.msra.gmra.mxu0 %vm988_vm0, %v749_v16  ;;  %2988 = vmatmul.mubr.msk.f32.vlgmr.msra.gmra.mxu1 %vm988_vm0, %v3742_v63 }
 0x2ed   :  { %2894 = vmatprep.mubr.msk.f32.mxu0 %vm988_vm0, %v750_v18  ;;  %2990 = vmatprep.mubr.msk.f32.mxu1 %vm988_vm0, %v3744_v55  ;;  %v3826_v38 = vpop.trf.xlu0 }
 0x2ee   :  { %v2080_v59 = vrot.slane %v2079_v3, 2 }
 0x2f0   :  { %v2081_v48 = vadd.f32 %v2080_v59, %v2079_v3  ;;  %2895 = vmatmul.mubr.msk.f32.gmra.mxu0 %vm988_vm0, %v751_v21  ;;  %2991 = vmatmul.mubr.msk.f32.gmra.mxu1 %vm988_vm0, %v3746_v56  ;;  %v716_v56 = vsel %vm715_vm1, %v714_v50, 0.0 }
 0x2f1   :  { %2897 = vmatprep.mubr.msk.f32.mxu0 %vm988_vm0, %v752_v23  ;;  %2993 = vmatprep.mubr.msk.f32.mxu1 %vm988_vm0, %v3748_v57  ;;  %v3834_v62 = vpop.trf.xlu0 }
 0x2f2   :  { %v2082_v54 = vrot.slane %v2081_v48, 1 }
 0x2f4   :  { %v2083_v52 = vadd.f32 %v2082_v54, %v2081_v48  ;;  %2898 = vmatmul.mubr.msk.f32.gmra.mxu0 %vm988_vm0, %v753_v25  ;;  %2994 = vmatmul.mubr.msk.f32.gmra.mxu1 %vm988_vm0, %v3750_v60 }
 0x2f5   :  { %2900 = vmatprep.mubr.msk.f32.mxu0 %vm988_vm0, %v754_v9  ;;  %2996 = vmatprep.mubr.msk.f32.mxu1 %vm988_vm0, %v3752_v0  ;;  %v3842_v3 = vpop.trf.xlu0 }
 0x2f6   :  { %v2468_v63 = vmul.f32 0.000125, %v2083_v52 }
 0x2f8   :  { %v2469_v55 = vsub.f32 %v3731_v20, %v2468_v63  ;;  %2901 = vmatmul.mubr.msk.f32.gmra.mxu0 %vm988_vm0, %v755_v29  ;;  %2997 = vmatmul.mubr.msk.f32.gmra.mxu1 %vm988_vm0, %v3754_v5 }
 0x2f9   :  { %2903 = vmatprep.mubr.msk.f32.mxu0 %vm988_vm0, %v756_v32  ;;  %2999 = vmatprep.mubr.msk.f32.mxu1 %vm988_vm0, %v3756_v4  ;;  %v3851_v57 = vpop.trf.xlu0 }
 0x2fa   :  { %2470 = vst [vmem:[%s4766_s5] sm:$0x1] %v2469_v55  ;;  %717 = vadd.xlane.f32.xlu0 %v716_v56 }
 0x2fc   :  { %2904 = vmatmul.mubr.msk.f32.gmra.mxu0 %vm988_vm0, %v757_v35  ;;  %3000 = vmatmul.mubr.msk.f32.gmra.mxu1 %vm988_vm0, %v3758_v7 }
 0x2fd   :  { %2906 = vmatprep.mubr.msk.f32.mxu0 %vm988_vm0, %v758_v39  ;;  %3002 = vmatprep.mubr.msk.f32.mxu1 %vm988_vm0, %v3760_v10  ;;  %v3862_v20 = vpop.trf.xlu0 }
 0x300   :  { %2907 = vmatmul.mubr.msk.f32.gmra.mxu0 %vm988_vm0, %v759_v41  ;;  %3003 = vmatmul.mubr.msk.f32.gmra.mxu1 %vm988_vm0, %v3762_v12 }
 0x301   :  { %2909 = vmatprep.mubr.msk.f32.mxu0 %vm988_vm0, %v760_v45  ;;  %3005 = vmatprep.mubr.msk.f32.mxu1 %vm988_vm0, %v3764_v14  ;;  %v3870_v50 = vpop.trf.xlu0 }
 0x304   :  { %2910 = vmatmul.mubr.msk.f32.gmra.mxu0 %vm988_vm0, %v761_v49  ;;  %3006 = vmatmul.mubr.msk.f32.gmra.mxu1 %vm988_vm0, %v3766_v15 }
 0x305   :  { %2912 = vmatprep.mubr.msk.f32.mxu0 %vm988_vm0, %v762_v6  ;;  %3008 = vmatprep.mubr.msk.f32.mxu1 %vm988_vm0, %v3769_v17  ;;  %v3878_v60 = vpop.trf.xlu0 }
 0x307   :  { %956 = vxpose.xlu1.b32.start.end [1/1] (short) %v3706_v11, 128 }
 0x308   :  { %2913 = vmatmul.mubr.msk.f32.gmra.mxu0 %vm988_vm0, %v763_v34  ;;  %3009 = vmatmul.mubr.msk.f32.gmra.mxu1 %vm988_vm0, %v3772_v19 }
 0x309   :  { %v908_v0 = vpop.trf.xlu1  ;;  %2915 = vmatprep.mubr.msk.f32.mxu0 %vm988_vm0, %v3774_v1  ;;  %v3886_v5 = vpop.trf.xlu0 }
 0x30a   :  { %3011 = vmatprep.mubr.msk.f32.mxu1 %vm988_vm0, %v908_v0 }
 0x30c   :  { %2916 = vmatmul.mubr.msk.f32.gmra.mxu0 %vm988_vm0, %v3776_v22 }
 0x30d   :  { %v909_v6 = vpop.trf.xlu1  ;;  %2918 = vmatprep.mubr.msk.f32.mxu0 %vm988_vm0, %v3778_v24  ;;  %v3893_v11 = vpop.trf.xlu0 }
 0x30e   :  { %3012 = vmatmul.mubr.msk.f32.gmra.mxu1 %vm988_vm0, %v909_v6 }
 0x310   :  { %2919 = vmatmul.mubr.msk.f32.gmra.mxu0 %vm988_vm0, %v3780_v26 }
 0x311   :  { %v910_v34 = vpop.trf.xlu1  ;;  %2921 = vmatprep.mubr.msk.f32.mxu0 %vm988_vm0, %v3782_v27  ;;  %v3900_v4 = vpop.trf.xlu0 }
 0x312   :  { %3014 = vmatprep.mubr.msk.f32.mxu1 %vm988_vm0, %v910_v34 }
 0x314   :  { %2922 = vmatmul.mubr.msk.f32.gmra.mxu0 %vm988_vm0, %v3784_v28 }
 0x315   :  { %v911_v7 = vpop.trf.xlu1  ;;  %2924 = vmatprep.mubr.msk.f32.mxu0 %vm988_vm0, %v3786_v2  ;;  %v844_v10 = vpop.trf.xlu0 }
 0x316   :  { %3015 = vmatmul.mubr.msk.f32.gmra.mxu1 %vm988_vm0, %v911_v7 }
 0x318   :  { %2925 = vmatmul.mubr.msk.f32.gmra.mxu0 %vm988_vm0, %v3788_v31 }
 0x319   :  { %v912_v12 = vpop.trf.xlu1  ;;  %2927 = vmatprep.mubr.msk.f32.mxu0 %vm988_vm0, %v3790_v33  ;;  %v845_v14 = vpop.trf.xlu0 }
 0x31a   :  { %3017 = vmatprep.mubr.msk.f32.mxu1 %vm988_vm0, %v912_v12 }
 0x31c   :  { %2928 = vmatmul.mubr.msk.f32.gmra.mxu0 %vm988_vm0, %v3792_v36 }
 0x31d   :  { %v913_v15 = vpop.trf.xlu1  ;;  %2930 = vmatprep.mubr.msk.f32.mxu0 %vm988_vm0, %v3794_v37  ;;  %v846_v16 = vpop.trf.xlu0 }
 0x31e   :  { %3018 = vmatmul.mubr.msk.f32.gmra.mxu1 %vm988_vm0, %v913_v15 }
 0x320   :  { %2931 = vmatmul.mubr.msk.f32.gmra.mxu0 %vm988_vm0, %v3796_v40 }
 0x321   :  { %v914_v17 = vpop.trf.xlu1  ;;  %2933 = vmatprep.mubr.msk.f32.mxu0 %vm988_vm0, %v3798_v43  ;;  %v847_v18 = vpop.trf.xlu0 }
 0x322   :  { %3020 = vmatprep.mubr.msk.f32.mxu1 %vm988_vm0, %v914_v17  ;;  %v4793_v17 = vld [vmem:[#allocation15_spill] sm:$0xff] }
 0x324   :  { %2934 = vmatmul.mubr.msk.f32.gmra.mxu0 %vm988_vm0, %v3800_v44 }
 0x325   :  { %v915_v19 = vpop.trf.xlu1  ;;  %2936 = vmatprep.mubr.msk.f32.mxu0 %vm988_vm0, %v3803_v47  ;;  %v848_v21 = vpop.trf.xlu0 }
 0x326   :  { %3021 = vmatmul.mubr.msk.f32.gmra.mxu1 %vm988_vm0, %v915_v19 }
 0x328   :  { %2937 = vmatmul.mubr.msk.f32.gmra.mxu0 %vm988_vm0, %v3805_v51 }
 0x329   :  { %v916_v1 = vpop.trf.xlu1  ;;  %2939 = vmatprep.mubr.msk.f32.mxu0 %vm988_vm0, %v3807_v53  ;;  %v849_v22 = vpop.trf.xlu0 }
 0x32a   :  { %3023 = vmatprep.mubr.msk.f32.mxu1 %vm988_vm0, %v916_v1 }
 0x32c   :  { %2940 = vmatmul.mubr.msk.f32.gmra.mxu0 %vm988_vm0, %v3809_v61 }
 0x32d   :  { %v917_v23 = vpop.trf.xlu1  ;;  %2942 = vmatprep.mubr.msk.f32.mxu0 %vm988_vm0, %v3811_v30  ;;  %v850_v25 = vpop.trf.xlu0 }
 0x32e   :  { %3024 = vmatmul.mubr.msk.f32.gmra.mxu1 %vm988_vm0, %v917_v23  ;;  %v4794_v23 = vld [vmem:[#allocation5_spill] sm:$0xff] }
 0x330   :  { %2943 = vmatmul.mubr.msk.f32.gmra.mxu0 %vm988_vm0, %v3813_v42 }
 0x331   :  { %v918_v24 = vpop.trf.xlu1  ;;  %2945 = vmatprep.mubr.msk.f32.mxu0 %vm988_vm0, %v3815_v46  ;;  %v851_v30 = vpop.trf.xlu0 }
 0x332   :  { %3026 = vmatprep.mubr.msk.f32.mxu1 %vm988_vm0, %v918_v24 }
 0x334   :  { %2946 = vmatmul.mubr.msk.f32.gmra.mxu0 %vm988_vm0, %v3818_v8 }
 0x335   :  { %v919_v61 = vpop.trf.xlu1  ;;  %2948 = vmatprep.mubr.msk.f32.mxu0 %vm988_vm0, %v3826_v38  ;;  %v852_v8 = vpop.trf.xlu0 }
 0x336   :  { %3027 = vmatmul.mubr.msk.f32.gmra.mxu1 %vm988_vm0, %v919_v61 }
 0x338   :  { %2949 = vmatmul.mubr.msk.f32.gmra.mxu0 %vm988_vm0, %v3834_v62 }
 0x339   :  { %v920_v42 = vpop.trf.xlu1  ;;  %2951 = vmatprep.mubr.msk.f32.mxu0 %vm988_vm0, %v3842_v3  ;;  %v853_v27 = vpop.trf.xlu0 }
 0x33a   :  { %3029 = vmatprep.mubr.msk.f32.mxu1 %vm988_vm0, %v920_v42 }
 0x33c   :  { %2952 = vmatmul.mubr.msk.f32.gmra.mxu0 %vm988_vm0, %v3851_v57 }
 0x33d   :  { %v921_v46 = vpop.trf.xlu1  ;;  %2954 = vmatprep.mubr.msk.f32.mxu0 %vm988_vm0, %v3862_v20  ;;  %v854_v29 = vpop.trf.xlu0 }
 0x33e   :  { %3030 = vmatmul.mubr.msk.f32.gmra.mxu1 %vm988_vm0, %v921_v46 }
 0x340   :  { %2955 = vmatmul.mubr.msk.f32.gmra.mxu0 %vm988_vm0, %v3870_v50 }
 0x341   :  { %v922_v26 = vpop.trf.xlu1  ;;  %2957 = vmatprep.mubr.msk.f32.mxu0 %vm988_vm0, %v3878_v60  ;;  %v855_v31 = vpop.trf.xlu0 }
 0x342   :  { %3032 = vmatprep.mubr.msk.f32.mxu1 %vm988_vm0, %v922_v26 }
 0x344   :  { %2958 = vmatmul.mubr.msk.f32.gmra.mxu0 %vm988_vm0, %v3886_v5 }
 0x345   :  { %v923_v9 = vpop.trf.xlu1  ;;  %2960 = vmatprep.mubr.msk.f32.mxu0 %vm988_vm0, %v3893_v11  ;;  %v856_v35 = vpop.trf.xlu0 }
 0x346   :  { %3033 = vmatmul.mubr.msk.f32.gmra.mxu1 %vm988_vm0, %v923_v9  ;;  %v4796_v9 = vld [vmem:[#allocation12_spill] sm:$0xff] }
 0x348   :  { %2961 = vmatmul.mubr.msk.f32.gmra.mxu0 %vm988_vm0, %v3900_v4 }
 0x349   :  { %v940_v28 = vpop.trf.xlu1  ;;  %2963 = vmatprep.mubr.msk.f32.mxu0 %vm988_vm0, %v844_v10  ;;  %v857_v37 = vpop.trf.xlu0 }
 0x34a   :  { %3035 = vmatprep.mubr.msk.f32.mxu1 %vm988_vm0, %v940_v28 }
 0x34c   :  { %2964 = vmatmul.mubr.msk.f32.gmra.mxu0 %vm988_vm0, %v845_v14 }
 0x34d   :  { %v941_v2 = vpop.trf.xlu1  ;;  %2966 = vmatprep.mubr.msk.f32.mxu0 %vm988_vm0, %v846_v16  ;;  %v858_v41 = vpop.trf.xlu0 }
 0x34e   :  { %3036 = vmatmul.mubr.msk.f32.gmra.mxu1 %vm988_vm0, %v941_v2 }
 0x350   :  { %2967 = vmatmul.mubr.msk.f32.gmra.mxu0 %vm988_vm0, %v847_v18 }
 0x351   :  { %v942_v32 = vpop.trf.xlu1  ;;  %2969 = vmatprep.mubr.msk.f32.mxu0 %vm988_vm0, %v848_v21  ;;  %v859_v44 = vpop.trf.xlu0 }
 0x352   :  { %3038 = vmatprep.mubr.msk.f32.mxu1 %vm988_vm0, %v942_v32 }
 0x354   :  { %2970 = vmatmul.mubr.msk.f32.gmra.mxu0 %vm988_vm0, %v849_v22 }
 0x355   :  { %v943_v33 = vpop.trf.xlu1  ;;  %2972 = vmatprep.mubr.msk.f32.mxu0 %vm988_vm0, %v850_v25  ;;  %v4795_v25 = vld [vmem:[#allocation17_spill] sm:$0xff] }
 0x356   :  { %3039 = vmatmul.mubr.msk.f32.gmra.mxu1 %vm988_vm0, %v943_v33 }
 0x358   :  { %2973 = vmatmul.mubr.msk.f32.gmra.mxu0 %vm988_vm0, %v851_v30 }
 0x359   :  { %v944_v36 = vpop.trf.xlu1  ;;  %2975 = vmatprep.mubr.msk.f32.mxu0 %vm988_vm0, %v852_v8 }
 0x35a   :  { %3041 = vmatprep.mubr.msk.f32.mxu1 %vm988_vm0, %v944_v36  ;;  %v4797_v36 = vld [vmem:[#allocation13_spill] sm:$0xff] }
 0x35c   :  { %2976 = vmatmul.mubr.msk.f32.gmra.mxu0 %vm988_vm0, %v853_v27 }
 0x35d   :  { %v945_v39 = vpop.trf.xlu1  ;;  %2978 = vmatprep.mubr.msk.f32.mxu0 %vm988_vm0, %v854_v29 }
 0x35e   :  { %3042 = vmatmul.mubr.msk.f32.gmra.mxu1 %vm988_vm0, %v945_v39 }
 0x360   :  { %2979 = vmatmul.mubr.msk.f32.gmra.mxu0 %vm988_vm0, %v855_v31 }
 0x361   :  { %v946_v40 = vpop.trf.xlu1  ;;  %2981 = vmatprep.mubr.msk.f32.mxu0 %vm988_vm0, %v856_v35 }
 0x362   :  { %3044 = vmatprep.mubr.msk.f32.mxu1 %vm988_vm0, %v946_v40 }
 0x364   :  { %2982 = vmatmul.mubr.msk.f32.gmra.mxu0 %vm988_vm0, %v857_v37 }
 0x365   :  { %v947_v43 = vpop.trf.xlu1  ;;  %2984 = vmatprep.mubr.msk.f32.mxu0 %vm988_vm0, %v858_v41 }
 0x366   :  { %3045 = vmatmul.mubr.msk.f32.gmra.mxu1 %vm988_vm0, %v947_v43 }
 0x368   :  { %2985 = vmatmul.mubr.msk.f32.gmra.mxu0 %vm988_vm0, %v859_v44 }
 0x369   :  { %v948_v45 = vpop.trf.xlu1 }
 0x36a   :  { %3047 = vmatprep.mubr.msk.f32.mxu1 %vm988_vm0, %v948_v45 }
 0x36d   :  { %v949_v47 = vpop.trf.xlu1 }
 0x36e   :  { %3048 = vmatmul.mubr.msk.f32.gmra.mxu1 %vm988_vm0, %v949_v47 }
 0x371   :  { %v950_v49 = vpop.trf.xlu1 }
 0x372   :  { %3050 = vmatprep.mubr.msk.f32.mxu1 %vm988_vm0, %v950_v49  ;;  %v4798_v49 = vld [vmem:[#allocation10_spill] sm:$0xff] }
 0x375   :  { %v951_v51 = vpop.trf.xlu1 }
 0x376   :  { %3051 = vmatmul.mubr.msk.f32.gmra.mxu1 %vm988_vm0, %v951_v51 }
 0x379   :  { %v952_v53 = vpop.trf.xlu1 }
 0x37a   :  { %3053 = vmatprep.mubr.msk.f32.mxu1 %vm988_vm0, %v952_v53 }
 0x37d   :  { %v953_v13 = vpop.trf.xlu1 }
 0x37e   :  { %3054 = vmatmul.mubr.msk.f32.gmra.mxu1 %vm988_vm0, %v953_v13 }
 0x381   :  { %v954_v38 = vpop.trf.xlu1 }
 0x382   :  { %3056 = vmatprep.mubr.msk.f32.mxu1 %vm988_vm0, %v954_v38 }
 0x383   :  { %v718_v59 = vpop.xlane.xlu0 %717 }
 0x384   :  { %v719_v48 = vrot.slane %v718_v59, 4 }
 0x385   :  { %v955_v62 = vpop.trf.xlu1 }
 0x386   :  { %v720_v54 = vadd.f32 %v719_v48, %v718_v59  ;;  %3057 = vmatmul.mubr.msk.f32.gmra.mxu1 %vm988_vm0, %v955_v62 }
 0x388   :  { %v721_v52 = vrot.slane %v720_v54, 2 }
 0x389   :  { %v972_v3 = vpop.trf.xlu1 }
 0x38a   :  { %3059 = vmatprep.mubr.msk.f32.mxu1 %vm988_vm0, %v972_v3  ;;  %v722_v63 = vadd.f32 %v721_v52, %v720_v54  ;;  %v4799_v54 = vld [vmem:[#allocation11_spill] sm:$0xff] }
 0x38c   :  { %v723_v55 = vrot.slane %v722_v63, 1 }
 0x38d   :  { %v973_v56 = vpop.trf.xlu1 }
 0x38e   :  { %3060 = vmatmul.mubr.msk.f32.gmra.mxu1 %vm988_vm0, %v973_v56  ;;  %v724_v57 = vadd.f32 %v723_v55, %v722_v63 }
 0x390   :  { %3085 = vpush %v724_v57 }
 0x391   :  { %v974_v20 = vpop.trf.xlu1 }
 0x392   :  { %3062 = vmatprep.mubr.msk.f32.mxu1 %vm988_vm0, %v974_v20 }
 0x395   :  { %v975_v50 = vpop.trf.xlu1 }
 0x396   :  { %3063 = vmatmul.mubr.msk.f32.gmra.mxu1 %vm988_vm0, %v975_v50 }
 0x399   :  { %v976_v60 = vpop.trf.xlu1 }
 0x39a   :  { %3065 = vmatprep.mubr.msk.f32.mxu1 %vm988_vm0, %v976_v60  ;;  %v4800_v60 = vld [vmem:[#allocation8_spill] sm:$0xff] }
 0x39d   :  { %v977_v0 = vpop.trf.xlu1 }
 0x39e   :  { %3066 = vmatmul.mubr.msk.f32.gmra.mxu1 %vm988_vm0, %v977_v0 }
 0x3a1   :  { %v978_v5 = vpop.trf.xlu1 }
 0x3a2   :  { %3068 = vmatprep.mubr.msk.f32.mxu1 %vm988_vm0, %v978_v5 }
 0x3a5   :  { %v979_v6 = vpop.trf.xlu1 }
 0x3a6   :  { %3069 = vmatmul.mubr.msk.f32.gmra.mxu1 %vm988_vm0, %v979_v6 }
 0x3a9   :  { %v980_v11 = vpop.trf.xlu1 }
 0x3aa   :  { %3071 = vmatprep.mubr.msk.f32.mxu1 %vm988_vm0, %v980_v11 }
 0x3ac   :  { %v2893_v34 = vpop.f32.mrf.mxu0  ;;  %v2989_v4 = vpop.f32.mrf.mxu1 }
 0x3ad   :  { %v2085_v7 = vmul.f32 0.000125, %v2893_v34  ;;  %v2149_v10 = vmul.f32 0.000125, %v2989_v4  ;;  %v981_v12 = vpop.trf.xlu1 }
 0x3ae   :  { %v1439_v14 = vpop.f32.mrf.mxu0  ;;  %v1759_v15 = vpop.f32.mrf.mxu1  ;;  %3072 = vmatmul.mubr.msk.f32.gmra.mxu1 %vm988_vm0, %v981_v12 }
 0x3af   :  { %v2213_v16 = vsub.f32 %v3427_v58, %v2085_v7  ;;  %v2277_v18 = vsub.f32 %v4793_v17, %v2149_v10  ;;  %v2084_v19 = vmul.f32 0.000125, %v1439_v14  ;;  %v2148_v21 = vmul.f32 0.000125, %v1759_v15  ;;  %v4801_v10 = vld [vmem:[#allocation9_spill] sm:$0xff] }
 0x3b0   :  { %v2896_v1 = vpop.f32.mrf.mxu0  ;;  %v2992_v22 = vpop.f32.mrf.mxu1 }
 0x3b1   :  { %2341 = vst [vmem:[%s4765_s4 + $0x8] sm:$0xff] %v2213_v16  ;;  %2405 = vst [vmem:[%s4765_s4 + $0x208] sm:$0xff] %v2277_v18  ;;  %v2212_v24 = vsub.f32 %v4794_v23, %v2084_v19  ;;  %v2276_v61 = vsub.f32 %v4795_v25, %v2148_v21  ;;  %v2087_v30 = vmul.f32 0.000125, %v2896_v1  ;;  %v2151_v58 = vmul.f32 0.000125, %v2992_v22  ;;  %v982_v42 = vpop.trf.xlu1 }
 0x3b2   :  { %v1449_v46 = vpop.f32.mrf.mxu0  ;;  %v1769_v8 = vpop.f32.mrf.mxu1  ;;  %3074 = vmatprep.mubr.msk.f32.mxu1 %vm988_vm0, %v982_v42  ;;  %v4802_v1 = vld [vmem:[#allocation6_spill] sm:$0xff]  ;;  %v4803_v42 = vld [vmem:[#allocation7_spill] sm:$0xff] }
 0x3b3   :  { %2340 = vst [vmem:[%s4765_s4] sm:$0xff] %v2212_v24  ;;  %2404 = vst [vmem:[%s4765_s4 + $0x200] sm:$0xff] %v2276_v61  ;;  %v2279_v28 = vsub.f32 %v4796_v9, %v2151_v58  ;;  %v2086_v29 = vmul.f32 0.000125, %v1449_v46  ;;  %v2150_v2 = vmul.f32 0.000125, %v1769_v8 }
 0x3b4   :  { %v2899_v31 = vpop.f32.mrf.mxu0  ;;  %v2995_v32 = vpop.f32.mrf.mxu1 }
 0x3b5   :  { %v2278_v37 = vsub.f32 %v4797_v36, %v2150_v2  ;;  %v2089_v39 = vmul.f32 0.000125, %v2899_v31  ;;  %v2153_v40 = vmul.f32 0.000125, %v2995_v32  ;;  %v983_v41 = vpop.trf.xlu1 }
 0x3b6   :  { %v1459_v43 = vpop.f32.mrf.mxu0  ;;  %v1779_v44 = vpop.f32.mrf.mxu1  ;;  %3075 = vmatmul.mubr.msk.f32.gmra.mxu1 %vm988_vm0, %v983_v41 }
 0x3b7   :  { %v2281_v51 = vsub.f32 %v4798_v49, %v2153_v40  ;;  %v2088_v53 = vmul.f32 0.000125, %v1459_v43  ;;  %v2152_v13 = vmul.f32 0.000125, %v1779_v44 }
 0x3b8   :  { %v2902_v38 = vpop.f32.mrf.mxu0  ;;  %v2998_v59 = vpop.f32.mrf.mxu1 }
 0x3b9   :  { %v2280_v52 = vsub.f32 %v4799_v54, %v2152_v13  ;;  %v2091_v3 = vmul.f32 0.000125, %v2902_v38  ;;  %v2155_v63 = vmul.f32 0.000125, %v2998_v59  ;;  %v984_v55 = vpop.trf.xlu1 }
 0x3ba   :  { %v3095_v26 = vld [vmem:[%s4762_s1 + $0x18] sm:$0xff]  ;;  %v1469_v56 = vpop.f32.mrf.mxu0  ;;  %v1789_v57 = vpop.f32.mrf.mxu1  ;;  %3077 = vmatprep.mubr.msk.f32.mxu1 %vm988_vm0, %v984_v55 }
 0x3bb   :  { %v2215_v27 = vsub.f32 %v3095_v26, %v2087_v30  ;;  %2407 = vst [vmem:[%s4765_s4 + $0x218] sm:$0xff] %v2279_v28  ;;  %v2283_v0 = vsub.f32 %v4800_v60, %v2155_v63  ;;  %v2090_v5 = vmul.f32 0.000125, %v1469_v56  ;;  %v2154_v6 = vmul.f32 0.000125, %v1789_v57 }
 0x3bc   :  { %v2905_v11 = vpop.f32.mrf.mxu0  ;;  %v3001_v34 = vpop.f32.mrf.mxu1 }
 0x3bd   :  { %2343 = vst [vmem:[%s4765_s4 + $0x18] sm:$0xff] %v2215_v27  ;;  %v2282_v12 = vsub.f32 %v4801_v10, %v2154_v6  ;;  %v2093_v14 = vmul.f32 0.000125, %v2905_v11  ;;  %v2157_v15 = vmul.f32 0.000125, %v3001_v34  ;;  %v985_v16 = vpop.trf.xlu1 }
 0x3be   :  { %v1479_v17 = vpop.f32.mrf.mxu0  ;;  %v1799_v18 = vpop.f32.mrf.mxu1  ;;  %3078 = vmatmul.mubr.msk.f32.gmra.mxu1 %vm988_vm0, %v985_v16 }
 0x3bf   :  { %v2285_v22 = vsub.f32 %v4802_v1, %v2157_v15  ;;  %v2092_v23 = vmul.f32 0.000125, %v1479_v17  ;;  %v2156_v24 = vmul.f32 0.000125, %v1799_v18 }
 0x3c0   :  { %v2908_v25 = vpop.f32.mrf.mxu0  ;;  %v3004_v61 = vpop.f32.mrf.mxu1 }
 0x3c1   :  { %v2284_v46 = vsub.f32 %v4803_v42, %v2156_v24  ;;  %s3086_s0 = spop %3085  ;;  %v2095_v8 = vmul.f32 0.000125, %v2908_v25  ;;  %v2159_v26 = vmul.f32 0.000125, %v3004_v61  ;;  %v986_v27 = vpop.trf.xlu1 }
 0x3c2   :  { %s726_s19 = smul.f32 0.125, %s3086_s0  ;;  %v1489_v9 = vpop.f32.mrf.mxu0  ;;  %v1809_v28 = vpop.f32.mrf.mxu1  ;;  %3080 = vmatprep.mubr.msk.f32.mxu1 %vm988_vm0, %v986_v27 }
 0x3c4   :  { %v3096_v33 = vld [vmem:[%s4762_s1 + $0x10] sm:$0xff]  ;;  %728 = sst [smem:[#allocation2]] %s726_s19  ;;  %v2911_v36 = vpop.f32.mrf.mxu0 }
 0x3c5   :  { %v2214_v35 = vsub.f32 %v3096_v33, %v2086_v29  ;;  %2406 = vst [vmem:[%s4765_s4 + $0x210] sm:$0xff] %v2278_v37  ;;  %v2094_v33 = vmul.f32 0.000125, %v1489_v9  ;;  %v3007_v37 = vpop.f32.mrf.mxu1  ;;  %v2097_v44 = vmul.f32 0.000125, %v2911_v36 }
 0x3c6   :  { %v1499_v49 = vpop.f32.mrf.mxu0  ;;  %2478 = dma.smem_to_hbm %s3219_s7, 16, %s4764_s3, [#allocation3]  }
 0x3c7   :  { %2342 = vst [vmem:[%s4765_s4 + $0x10] sm:$0xff] %v2214_v35  ;;  %v2158_v35 = vmul.f32 0.000125, %v1809_v28 }
 0x3c8   :  { %v2914_v54 = vpop.f32.mrf.mxu0 }
 0x3c9   :  { %v2099_v57 = vmul.f32 0.000125, %v2914_v54 }
 0x3ce   :  { %v3097_v45 = vld [vmem:[%s4762_s1 + $0x28] sm:$0xff] }
 0x3cf   :  { %v2217_v47 = vsub.f32 %v3097_v45, %v2089_v39  ;;  %2409 = vst [vmem:[%s4765_s4 + $0x228] sm:$0xff] %v2281_v51  ;;  %v2161_v45 = vmul.f32 0.000125, %v3007_v37  ;;  %v1819_v51 = vpop.f32.mrf.mxu1 }
 0x3d1   :  { %2345 = vst [vmem:[%s4765_s4 + $0x28] sm:$0xff] %v2217_v47  ;;  %v987_v47 = vpop.trf.xlu1 }
 0x3d2   :  { %3081 = vmatmul.mubr.msk.f32.gmra.mxu1 %vm988_vm0, %v987_v47 }
 0x3d8   :  { %v3098_v48 = vld [vmem:[%s4762_s1 + $0x20] sm:$0xff] }
 0x3d9   :  { %v2216_v62 = vsub.f32 %v3098_v48, %v2088_v53  ;;  %2408 = vst [vmem:[%s4765_s4 + $0x220] sm:$0xff] %v2280_v52  ;;  %v2096_v48 = vmul.f32 0.000125, %v1499_v49  ;;  %v3010_v52 = vpop.f32.mrf.mxu1 }
 0x3db   :  { %2344 = vst [vmem:[%s4765_s4 + $0x20] sm:$0xff] %v2216_v62  ;;  %v2160_v62 = vmul.f32 0.000125, %v1819_v51  ;;  %v1829_v60 = vpop.f32.mrf.mxu1 }
 0x3dd   :  { %v3013_v18 = vpop.f32.mrf.mxu1 }
 0x3e2   :  { %v3099_v20 = vld [vmem:[%s4762_s1 + $0x38] sm:$0xff] }
 0x3e3   :  { %v2219_v50 = vsub.f32 %v3099_v20, %v2091_v3  ;;  %2411 = vst [vmem:[%s4765_s4 + $0x238] sm:$0xff] %v2283_v0  ;;  %v2163_v20 = vmul.f32 0.000125, %v3010_v52 }
 0x3e5   :  { %2347 = vst [vmem:[%s4765_s4 + $0x38] sm:$0xff] %v2219_v50  ;;  %v1509_v50 = vpop.f32.mrf.mxu0 }
 0x3e6   :  { %v2098_v34 = vmul.f32 0.000125, %v1509_v50 }
 0x3ec   :  { %v3100_v4 = vld [vmem:[%s4762_s1 + $0x30] sm:$0xff] }
 0x3ed   :  { %v2218_v7 = vsub.f32 %v3100_v4, %v2090_v5  ;;  %2410 = vst [vmem:[%s4765_s4 + $0x230] sm:$0xff] %v2282_v12  ;;  %v2162_v4 = vmul.f32 0.000125, %v1829_v60 }
 0x3ef   :  { %2346 = vst [vmem:[%s4765_s4 + $0x30] sm:$0xff] %v2218_v7  ;;  %v2917_v7 = vpop.f32.mrf.mxu0 }
 0x3f0   :  { %v2101_v16 = vmul.f32 0.000125, %v2917_v7 }
 0x3f1   :  { %v1519_v17 = vpop.f32.mrf.mxu0 }
 0x3f2   :  { %v2100_v1 = vmul.f32 0.000125, %v1519_v17 }
 0x3f3   :  { %v2920_v24 = vpop.f32.mrf.mxu0 }
 0x3f6   :  { %v3101_v19 = vld [vmem:[%s4762_s1 + $0x48] sm:$0xff] }
 0x3f7   :  { %v2221_v21 = vsub.f32 %v3101_v19, %v2093_v14  ;;  %2413 = vst [vmem:[%s4765_s4 + $0x248] sm:$0xff] %v2285_v22  ;;  %v2165_v22 = vmul.f32 0.000125, %v3013_v18 }
 0x3f9   :  { %2349 = vst [vmem:[%s4765_s4 + $0x48] sm:$0xff] %v2221_v21 }
 0x400   :  { %v3102_v30 = vld [vmem:[%s4762_s1 + $0x40] sm:$0xff] }
 0x401   :  { %v2220_v58 = vsub.f32 %v3102_v30, %v2092_v23  ;;  %2412 = vst [vmem:[%s4765_s4 + $0x240] sm:$0xff] %v2284_v46  ;;  %v1839_v23 = vpop.f32.mrf.mxu1  ;;  %v4804_v30 = vld [vmem:[#allocation14_spill] sm:$0xff]  ;;  %v2103_v46 = vmul.f32 0.000125, %v2920_v24 }
 0x402   :  { %v2164_v42 = vmul.f32 0.000125, %v1839_v23 }
 0x403   :  { %2348 = vst [vmem:[%s4765_s4 + $0x40] sm:$0xff] %v2220_v58  ;;  %v2293_v58 = vsub.f32 %v4804_v30, %v2165_v22 }
 0x40a   :  { %v3103_v29 = vld [vmem:[%s4762_s1 + $0x58] sm:$0xff] }
 0x40b   :  { %v2223_v2 = vsub.f32 %v3103_v29, %v2095_v8  ;;  %v3104_v31 = vld [vmem:[%s4762_s1 + $0x258] sm:$0xff]  ;;  %v1529_v8 = vpop.f32.mrf.mxu0 }
 0x40c   :  { %v2287_v32 = vsub.f32 %v3104_v31, %v2159_v26  ;;  %v4805_v26 = vld [vmem:[#allocation16_spill] sm:$0xff]  ;;  %v2102_v29 = vmul.f32 0.000125, %v1529_v8 }
 0x40d   :  { %2351 = vst [vmem:[%s4765_s4 + $0x58] sm:$0xff] %v2223_v2  ;;  %v2292_v27 = vsub.f32 %v4805_v26, %v2164_v42  ;;  %v2923_v2 = vpop.f32.mrf.mxu0 }
 0x40e   :  { %2415 = vst [vmem:[%s4765_s4 + $0x258] sm:$0xff] %v2287_v32 }
 0x40f   :  { %v1539_v36 = vpop.f32.mrf.mxu0 }
 0x415   :  { %v3105_v39 = vld [vmem:[%s4762_s1 + $0x50] sm:$0xff] }
 0x416   :  { %v2222_v40 = vsub.f32 %v3105_v39, %v2094_v33  ;;  %v3106_v41 = vld [vmem:[%s4762_s1 + $0x250] sm:$0xff]  ;;  %v2105_v33 = vmul.f32 0.000125, %v2923_v2 }
 0x417   :  { %v2286_v43 = vsub.f32 %v3106_v41, %v2158_v35  ;;  %v3016_v35 = vpop.f32.mrf.mxu1  ;;  %v2104_v41 = vmul.f32 0.000125, %v1539_v36 }
 0x418   :  { %2350 = vst [vmem:[%s4765_s4 + $0x50] sm:$0xff] %v2222_v40  ;;  %v2167_v37 = vmul.f32 0.000125, %v3016_v35 }
 0x419   :  { %2414 = vst [vmem:[%s4765_s4 + $0x250] sm:$0xff] %v2286_v43  ;;  %v1849_v43 = vpop.f32.mrf.mxu1 }
 0x41a   :  { %v2166_v49 = vmul.f32 0.000125, %v1849_v43 }
 0x420   :  { %v3107_v53 = vld [vmem:[%s4762_s1 + $0x68] sm:$0xff] }
 0x421   :  { %v2225_v13 = vsub.f32 %v3107_v53, %v2097_v44  ;;  %v3108_v38 = vld [vmem:[%s4762_s1 + $0x268] sm:$0xff]  ;;  %v2926_v44 = vpop.f32.mrf.mxu0 }
 0x422   :  { %v2289_v59 = vsub.f32 %v3108_v38, %v2161_v45 }
 0x423   :  { %2353 = vst [vmem:[%s4765_s4 + $0x68] sm:$0xff] %v2225_v13  ;;  %v2107_v13 = vmul.f32 0.000125, %v2926_v44  ;;  %v1549_v38 = vpop.f32.mrf.mxu0 }
 0x424   :  { %2417 = vst [vmem:[%s4765_s4 + $0x268] sm:$0xff] %v2289_v59  ;;  %v2106_v52 = vmul.f32 0.000125, %v1549_v38 }
 0x42b   :  { %v3109_v3 = vld [vmem:[%s4762_s1 + $0x60] sm:$0xff] }
 0x42c   :  { %v2224_v63 = vsub.f32 %v3109_v3, %v2096_v48  ;;  %v3110_v55 = vld [vmem:[%s4762_s1 + $0x260] sm:$0xff]  ;;  %v2929_v3 = vpop.f32.mrf.mxu0 }
 0x42d   :  { %v2288_v56 = vsub.f32 %v3110_v55, %v2160_v62 }
 0x42e   :  { %2352 = vst [vmem:[%s4765_s4 + $0x60] sm:$0xff] %v2224_v63 }
 0x42f   :  { %2416 = vst [vmem:[%s4765_s4 + $0x260] sm:$0xff] %v2288_v56  ;;  %v2109_v56 = vmul.f32 0.000125, %v2929_v3 }
 0x436   :  { %v3111_v0 = vld [vmem:[%s4762_s1 + $0x78] sm:$0xff] }
 0x437   :  { %v2227_v5 = vsub.f32 %v3111_v0, %v2099_v57  ;;  %v3112_v6 = vld [vmem:[%s4762_s1 + $0x278] sm:$0xff]  ;;  %v3019_v57 = vpop.f32.mrf.mxu1 }
 0x438   :  { %v2291_v11 = vsub.f32 %v3112_v6, %v2163_v20  ;;  %v1559_v20 = vpop.f32.mrf.mxu0  ;;  %v2169_v50 = vmul.f32 0.000125, %v3019_v57 }
 0x439   :  { %2355 = vst [vmem:[%s4765_s4 + $0x78] sm:$0xff] %v2227_v5  ;;  %v2108_v5 = vmul.f32 0.000125, %v1559_v20  ;;  %v1859_v6 = vpop.f32.mrf.mxu1 }
 0x43a   :  { %2419 = vst [vmem:[%s4765_s4 + $0x278] sm:$0xff] %v2291_v11  ;;  %v2932_v11 = vpop.f32.mrf.mxu0  ;;  %v2168_v7 = vmul.f32 0.000125, %v1859_v6 }
 0x441   :  { %v3113_v10 = vld [vmem:[%s4762_s1 + $0x70] sm:$0xff] }
 0x442   :  { %v2226_v12 = vsub.f32 %v3113_v10, %v2098_v34  ;;  %v3114_v14 = vld [vmem:[%s4762_s1 + $0x270] sm:$0xff] }
 0x443   :  { %v2290_v15 = vsub.f32 %v3114_v14, %v2162_v4  ;;  %v2111_v14 = vmul.f32 0.000125, %v2932_v11 }
 0x444   :  { %2354 = vst [vmem:[%s4765_s4 + $0x70] sm:$0xff] %v2226_v12 }
 0x445   :  { %2418 = vst [vmem:[%s4765_s4 + $0x270] sm:$0xff] %v2290_v15  ;;  %v1569_v15 = vpop.f32.mrf.mxu0 }
 0x44c   :  { %v3115_v19 = vld [vmem:[%s4762_s1 + $0x88] sm:$0xff] }
 0x44d   :  { %v2229_v21 = vsub.f32 %v3115_v19, %v2101_v16 }
 0x44f   :  { %2357 = vst [vmem:[%s4765_s4 + $0x88] sm:$0xff] %v2229_v21  ;;  %v2110_v21 = vmul.f32 0.000125, %v1569_v15 }
 0x456   :  { %v3116_v25 = vld [vmem:[%s4762_s1 + $0x80] sm:$0xff] }
 0x457   :  { %v2228_v61 = vsub.f32 %v3116_v25, %v2100_v1  ;;  %2421 = vst [vmem:[%s4765_s4 + $0x288] sm:$0xff] %v2293_v58  ;;  %v2935_v1 = vpop.f32.mrf.mxu0  ;;  %v3022_v25 = vpop.f32.mrf.mxu1 }
 0x458   :  { %v2113_v24 = vmul.f32 0.000125, %v2935_v1  ;;  %v2171_v30 = vmul.f32 0.000125, %v3022_v25 }
 0x459   :  { %2356 = vst [vmem:[%s4765_s4 + $0x80] sm:$0xff] %v2228_v61  ;;  %v1579_v61 = vpop.f32.mrf.mxu0  ;;  %v1869_v8 = vpop.f32.mrf.mxu1 }
 0x45b   :  { %v2938_v26 = vpop.f32.mrf.mxu0 }
 0x460   :  { %v3117_v9 = vld [vmem:[%s4762_s1 + $0x98] sm:$0xff] }
 0x461   :  { %v2231_v28 = vsub.f32 %v3117_v9, %v2103_v46  ;;  %2420 = vst [vmem:[%s4765_s4 + $0x280] sm:$0xff] %v2292_v27  ;;  %v2112_v46 = vmul.f32 0.000125, %v1579_v61 }
 0x463   :  { %2359 = vst [vmem:[%s4765_s4 + $0x98] sm:$0xff] %v2231_v28  ;;  %v2170_v28 = vmul.f32 0.000125, %v1869_v8 }
 0x46a   :  { %v3118_v31 = vld [vmem:[%s4762_s1 + $0x90] sm:$0xff] }
 0x46b   :  { %v2230_v32 = vsub.f32 %v3118_v31, %v2102_v29  ;;  %v2115_v31 = vmul.f32 0.000125, %v2938_v26 }
 0x46d   :  { %2358 = vst [vmem:[%s4765_s4 + $0x90] sm:$0xff] %v2230_v32  ;;  %v1589_v32 = vpop.f32.mrf.mxu0 }
 0x474   :  { %v3119_v39 = vld [vmem:[%s4762_s1 + $0xa8] sm:$0xff]  ;;  %v3120_v45 = vld [vmem:[%s4762_s1 + $0x298] sm:$0xff] }
 0x475   :  { %v2233_v40 = vsub.f32 %v3119_v39, %v2105_v33  ;;  %v2295_v47 = vsub.f32 %v3120_v45, %v2167_v37  ;;  %v2114_v39 = vmul.f32 0.000125, %v1589_v32  ;;  %v3025_v45 = vpop.f32.mrf.mxu1 }
 0x477   :  { %2361 = vst [vmem:[%s4765_s4 + $0xa8] sm:$0xff] %v2233_v40  ;;  %v2941_v40 = vpop.f32.mrf.mxu0  ;;  %v1879_v38 = vpop.f32.mrf.mxu1 }
 0x478   :  { %v2117_v44 = vmul.f32 0.000125, %v2941_v40 }
 0x47e   :  { %v3121_v51 = vld [vmem:[%s4762_s1 + $0xa0] sm:$0xff] }
 0x47f   :  { %v2232_v53 = vsub.f32 %v3121_v51, %v2104_v41  ;;  %2423 = vst [vmem:[%s4765_s4 + $0x298] sm:$0xff] %v2295_v47  ;;  %v1599_v47 = vpop.f32.mrf.mxu0 }
 0x486   :  { %v3122_v59 = vld [vmem:[%s4762_s1 + $0x290] sm:$0xff] }
 0x487   :  { %v2294_v48 = vsub.f32 %v3122_v59, %v2166_v49  ;;  %2360 = vst [vmem:[%s4765_s4 + $0xa0] sm:$0xff] %v2232_v53  ;;  %v2173_v49 = vmul.f32 0.000125, %v3025_v45  ;;  %v2944_v59 = vpop.f32.mrf.mxu0 }
 0x48e   :  { %v3123_v62 = vld [vmem:[%s4762_s1 + $0xb8] sm:$0xff] }
 0x48f   :  { %v2235_v54 = vsub.f32 %v3123_v62, %v2107_v13  ;;  %2422 = vst [vmem:[%s4765_s4 + $0x290] sm:$0xff] %v2294_v48  ;;  %v2116_v13 = vmul.f32 0.000125, %v1599_v47 }
 0x491   :  { %2363 = vst [vmem:[%s4765_s4 + $0xb8] sm:$0xff] %v2235_v54  ;;  %v2172_v54 = vmul.f32 0.000125, %v1879_v38 }
 0x498   :  { %v3124_v63 = vld [vmem:[%s4762_s1 + $0xb0] sm:$0xff] }
 0x499   :  { %v2234_v55 = vsub.f32 %v3124_v63, %v2106_v52  ;;  %v2119_v63 = vmul.f32 0.000125, %v2944_v59 }
 0x49b   :  { %2362 = vst [vmem:[%s4765_s4 + $0xb0] sm:$0xff] %v2234_v55  ;;  %v1609_v55 = vpop.f32.mrf.mxu0 }
 0x4a2   :  { %v3125_v60 = vld [vmem:[%s4762_s1 + $0xc8] sm:$0xff] }
 0x4a3   :  { %v2237_v0 = vsub.f32 %v3125_v60, %v2109_v56  ;;  %v3126_v34 = vld [vmem:[%s4762_s1 + $0x2a8] sm:$0xff]  ;;  %v2118_v60 = vmul.f32 0.000125, %v1609_v55 }
 0x4a4   :  { %v2297_v4 = vsub.f32 %v3126_v34, %v2169_v50  ;;  %v3028_v34 = vpop.f32.mrf.mxu1 }
 0x4a5   :  { %2365 = vst [vmem:[%s4765_s4 + $0xc8] sm:$0xff] %v2237_v0  ;;  %v2947_v0 = vpop.f32.mrf.mxu0 }
 0x4a6   :  { %v2121_v11 = vmul.f32 0.000125, %v2947_v0  ;;  %v1889_v15 = vpop.f32.mrf.mxu1 }
 0x4ac   :  { %v3127_v10 = vld [vmem:[%s4762_s1 + $0xc0] sm:$0xff] }
 0x4ad   :  { %v2236_v12 = vsub.f32 %v3127_v10, %v2108_v5  ;;  %2425 = vst [vmem:[%s4765_s4 + $0x2a8] sm:$0xff] %v2297_v4  ;;  %v1619_v4 = vpop.f32.mrf.mxu0 }
 0x4b4   :  { %v3128_v16 = vld [vmem:[%s4762_s1 + $0x2a0] sm:$0xff] }
 0x4b5   :  { %v2296_v17 = vsub.f32 %v3128_v16, %v2168_v7  ;;  %2364 = vst [vmem:[%s4765_s4 + $0xc0] sm:$0xff] %v2236_v12  ;;  %v2175_v7 = vmul.f32 0.000125, %v3028_v34  ;;  %v2950_v16 = vpop.f32.mrf.mxu0 }
 0x4bc   :  { %v3129_v18 = vld [vmem:[%s4762_s1 + $0xd8] sm:$0xff] }
 0x4bd   :  { %v2239_v19 = vsub.f32 %v3129_v18, %v2111_v14  ;;  %2424 = vst [vmem:[%s4765_s4 + $0x2a0] sm:$0xff] %v2296_v17  ;;  %v2120_v14 = vmul.f32 0.000125, %v1619_v4 }
 0x4bf   :  { %2367 = vst [vmem:[%s4765_s4 + $0xd8] sm:$0xff] %v2239_v19  ;;  %v2174_v19 = vmul.f32 0.000125, %v1889_v15 }
 0x4c6   :  { %v3130_v22 = vld [vmem:[%s4762_s1 + $0xd0] sm:$0xff] }
 0x4c7   :  { %v2238_v23 = vsub.f32 %v3130_v22, %v2110_v21  ;;  %v2123_v22 = vmul.f32 0.000125, %v2950_v16 }
 0x4c9   :  { %2366 = vst [vmem:[%s4765_s4 + $0xd0] sm:$0xff] %v2238_v23  ;;  %v1629_v23 = vpop.f32.mrf.mxu0 }
 0x4d0   :  { %v3131_v58 = vld [vmem:[%s4762_s1 + $0xe8] sm:$0xff]  ;;  %v3132_v27 = vld [vmem:[%s4762_s1 + $0x2b8] sm:$0xff] }
 0x4d1   :  { %v2241_v42 = vsub.f32 %v3131_v58, %v2113_v24  ;;  %v2299_v9 = vsub.f32 %v3132_v27, %v2171_v30  ;;  %v2122_v58 = vmul.f32 0.000125, %v1629_v23  ;;  %v3031_v27 = vpop.f32.mrf.mxu1 }
 0x4d3   :  { %2369 = vst [vmem:[%s4765_s4 + $0xe8] sm:$0xff] %v2241_v42  ;;  %v2953_v42 = vpop.f32.mrf.mxu0  ;;  %v1899_v32 = vpop.f32.mrf.mxu1 }
 0x4d4   :  { %v2125_v26 = vmul.f32 0.000125, %v2953_v42 }
 0x4da   :  { %v3133_v29 = vld [vmem:[%s4762_s1 + $0xe0] sm:$0xff] }
 0x4db   :  { %v2240_v2 = vsub.f32 %v3133_v29, %v2112_v46  ;;  %2427 = vst [vmem:[%s4765_s4 + $0x2b8] sm:$0xff] %v2299_v9  ;;  %v1639_v9 = vpop.f32.mrf.mxu0 }
 0x4e2   :  { %v3134_v33 = vld [vmem:[%s4762_s1 + $0x2b0] sm:$0xff] }
 0x4e3   :  { %v2298_v35 = vsub.f32 %v3134_v33, %v2170_v28  ;;  %2368 = vst [vmem:[%s4765_s4 + $0xe0] sm:$0xff] %v2240_v2  ;;  %v2177_v28 = vmul.f32 0.000125, %v3031_v27  ;;  %v2956_v33 = vpop.f32.mrf.mxu0 }
 0x4ea   :  { %v3135_v36 = vld [vmem:[%s4762_s1 + $0xf8] sm:$0xff] }
 0x4eb   :  { %v2243_v37 = vsub.f32 %v3135_v36, %v2115_v31  ;;  %2426 = vst [vmem:[%s4765_s4 + $0x2b0] sm:$0xff] %v2298_v35  ;;  %v2124_v31 = vmul.f32 0.000125, %v1639_v9 }
 0x4ed   :  { %2371 = vst [vmem:[%s4765_s4 + $0xf8] sm:$0xff] %v2243_v37  ;;  %v2176_v37 = vmul.f32 0.000125, %v1899_v32 }
 0x4f4   :  { %v3136_v41 = vld [vmem:[%s4762_s1 + $0xf0] sm:$0xff] }
 0x4f5   :  { %v2242_v43 = vsub.f32 %v3136_v41, %v2114_v39  ;;  %v2127_v41 = vmul.f32 0.000125, %v2956_v33 }
 0x4f7   :  { %2370 = vst [vmem:[%s4765_s4 + $0xf0] sm:$0xff] %v2242_v43  ;;  %v1649_v43 = vpop.f32.mrf.mxu0 }
 0x4fe   :  { %v3137_v51 = vld [vmem:[%s4762_s1 + $0x108] sm:$0xff] }
 0x4ff   :  { %v2245_v53 = vsub.f32 %v3137_v51, %v2117_v44  ;;  %v3138_v48 = vld [vmem:[%s4762_s1 + $0x2c8] sm:$0xff]  ;;  %v2126_v51 = vmul.f32 0.000125, %v1649_v43 }
 0x500   :  { %v2301_v62 = vsub.f32 %v3138_v48, %v2173_v49  ;;  %v3034_v48 = vpop.f32.mrf.mxu1 }
 0x501   :  { %2373 = vst [vmem:[%s4765_s4 + $0x108] sm:$0xff] %v2245_v53  ;;  %v2959_v53 = vpop.f32.mrf.mxu0 }
 0x502   :  { %v2129_v59 = vmul.f32 0.000125, %v2959_v53  ;;  %v1909_v55 = vpop.f32.mrf.mxu1 }
 0x508   :  { %v3139_v52 = vld [vmem:[%s4762_s1 + $0x100] sm:$0xff] }
 0x509   :  { %v2244_v3 = vsub.f32 %v3139_v52, %v2116_v13  ;;  %2429 = vst [vmem:[%s4765_s4 + $0x2c8] sm:$0xff] %v2301_v62  ;;  %v1659_v62 = vpop.f32.mrf.mxu0 }
 0x510   :  { %v3140_v56 = vld [vmem:[%s4762_s1 + $0x2c0] sm:$0xff] }
 0x511   :  { %v2300_v57 = vsub.f32 %v3140_v56, %v2172_v54  ;;  %2372 = vst [vmem:[%s4765_s4 + $0x100] sm:$0xff] %v2244_v3  ;;  %v2179_v54 = vmul.f32 0.000125, %v3034_v48  ;;  %v2962_v56 = vpop.f32.mrf.mxu0 }
 0x518   :  { %v3141_v20 = vld [vmem:[%s4762_s1 + $0x118] sm:$0xff] }
 0x519   :  { %v2247_v50 = vsub.f32 %v3141_v20, %v2119_v63  ;;  %2428 = vst [vmem:[%s4765_s4 + $0x2c0] sm:$0xff] %v2300_v57  ;;  %v2128_v63 = vmul.f32 0.000125, %v1659_v62 }
 0x51b   :  { %2375 = vst [vmem:[%s4765_s4 + $0x118] sm:$0xff] %v2247_v50  ;;  %v2178_v50 = vmul.f32 0.000125, %v1909_v55 }
 0x522   :  { %v3142_v5 = vld [vmem:[%s4762_s1 + $0x110] sm:$0xff] }
 0x523   :  { %v2246_v6 = vsub.f32 %v3142_v5, %v2118_v60  ;;  %v2131_v5 = vmul.f32 0.000125, %v2962_v56 }
 0x525   :  { %2374 = vst [vmem:[%s4765_s4 + $0x110] sm:$0xff] %v2246_v6  ;;  %v1669_v6 = vpop.f32.mrf.mxu0 }
 0x52c   :  { %v3143_v10 = vld [vmem:[%s4762_s1 + $0x128] sm:$0xff]  ;;  %v3144_v17 = vld [vmem:[%s4762_s1 + $0x2d8] sm:$0xff] }
 0x52d   :  { %v2249_v12 = vsub.f32 %v3143_v10, %v2121_v11  ;;  %v2303_v18 = vsub.f32 %v3144_v17, %v2175_v7  ;;  %v2130_v10 = vmul.f32 0.000125, %v1669_v6  ;;  %v3037_v17 = vpop.f32.mrf.mxu1 }
 0x52f   :  { %2377 = vst [vmem:[%s4765_s4 + $0x128] sm:$0xff] %v2249_v12  ;;  %v2965_v12 = vpop.f32.mrf.mxu0  ;;  %v1919_v23 = vpop.f32.mrf.mxu1 }
 0x530   :  { %v2133_v16 = vmul.f32 0.000125, %v2965_v12 }
 0x536   :  { %v3145_v21 = vld [vmem:[%s4762_s1 + $0x120] sm:$0xff] }
 0x537   :  { %v2248_v1 = vsub.f32 %v3145_v21, %v2120_v14  ;;  %2431 = vst [vmem:[%s4765_s4 + $0x2d8] sm:$0xff] %v2303_v18  ;;  %v1679_v18 = vpop.f32.mrf.mxu0 }
 0x53e   :  { %v3146_v24 = vld [vmem:[%s4762_s1 + $0x2d0] sm:$0xff] }
 0x53f   :  { %v2302_v25 = vsub.f32 %v3146_v24, %v2174_v19  ;;  %2376 = vst [vmem:[%s4765_s4 + $0x120] sm:$0xff] %v2248_v1  ;;  %v2181_v19 = vmul.f32 0.000125, %v3037_v17  ;;  %v2968_v24 = vpop.f32.mrf.mxu0 }
 0x546   :  { %v3147_v61 = vld [vmem:[%s4762_s1 + $0x138] sm:$0xff] }
 0x547   :  { %v2251_v30 = vsub.f32 %v3147_v61, %v2123_v22  ;;  %2430 = vst [vmem:[%s4765_s4 + $0x2d0] sm:$0xff] %v2302_v25  ;;  %v2132_v22 = vmul.f32 0.000125, %v1679_v18 }
 0x549   :  { %2379 = vst [vmem:[%s4765_s4 + $0x138] sm:$0xff] %v2251_v30  ;;  %v2180_v30 = vmul.f32 0.000125, %v1919_v23 }
 0x550   :  { %v3148_v46 = vld [vmem:[%s4762_s1 + $0x130] sm:$0xff] }
 0x551   :  { %v2250_v8 = vsub.f32 %v3148_v46, %v2122_v58  ;;  %v2135_v46 = vmul.f32 0.000125, %v2968_v24 }
 0x553   :  { %2378 = vst [vmem:[%s4765_s4 + $0x130] sm:$0xff] %v2250_v8  ;;  %v1689_v8 = vpop.f32.mrf.mxu0 }
 0x55a   :  { %v3149_v29 = vld [vmem:[%s4762_s1 + $0x148] sm:$0xff] }
 0x55b   :  { %v2253_v2 = vsub.f32 %v3149_v29, %v2125_v26  ;;  %v3150_v35 = vld [vmem:[%s4762_s1 + $0x2e8] sm:$0xff]  ;;  %v2134_v29 = vmul.f32 0.000125, %v1689_v8 }
 0x55c   :  { %v2305_v36 = vsub.f32 %v3150_v35, %v2177_v28  ;;  %v3040_v35 = vpop.f32.mrf.mxu1 }
 0x55d   :  { %2381 = vst [vmem:[%s4765_s4 + $0x148] sm:$0xff] %v2253_v2  ;;  %v2971_v2 = vpop.f32.mrf.mxu0 }
 0x55e   :  { %v2137_v33 = vmul.f32 0.000125, %v2971_v2  ;;  %v1929_v43 = vpop.f32.mrf.mxu1 }
 0x564   :  { %v3151_v39 = vld [vmem:[%s4762_s1 + $0x140] sm:$0xff] }
 0x565   :  { %v2252_v40 = vsub.f32 %v3151_v39, %v2124_v31  ;;  %2433 = vst [vmem:[%s4765_s4 + $0x2e8] sm:$0xff] %v2305_v36  ;;  %v1699_v36 = vpop.f32.mrf.mxu0 }
 0x56c   :  { %v3152_v44 = vld [vmem:[%s4762_s1 + $0x2e0] sm:$0xff] }
 0x56d   :  { %v2304_v45 = vsub.f32 %v3152_v44, %v2176_v37  ;;  %2380 = vst [vmem:[%s4765_s4 + $0x140] sm:$0xff] %v2252_v40  ;;  %v2183_v37 = vmul.f32 0.000125, %v3040_v35  ;;  %v2974_v44 = vpop.f32.mrf.mxu0 }
 0x574   :  { %v3153_v47 = vld [vmem:[%s4762_s1 + $0x158] sm:$0xff] }
 0x575   :  { %v2255_v49 = vsub.f32 %v3153_v47, %v2127_v41  ;;  %2432 = vst [vmem:[%s4765_s4 + $0x2e0] sm:$0xff] %v2304_v45  ;;  %v2136_v41 = vmul.f32 0.000125, %v1699_v36 }
 0x577   :  { %2383 = vst [vmem:[%s4765_s4 + $0x158] sm:$0xff] %v2255_v49  ;;  %v2182_v49 = vmul.f32 0.000125, %v1929_v43 }
 0x57e   :  { %v3154_v13 = vld [vmem:[%s4762_s1 + $0x150] sm:$0xff] }
 0x57f   :  { %v2254_v38 = vsub.f32 %v3154_v13, %v2126_v51  ;;  %v2139_v13 = vmul.f32 0.000125, %v2974_v44 }
 0x581   :  { %2382 = vst [vmem:[%s4765_s4 + $0x150] sm:$0xff] %v2254_v38  ;;  %v1709_v38 = vpop.f32.mrf.mxu0 }
 0x588   :  { %v3155_v52 = vld [vmem:[%s4762_s1 + $0x168] sm:$0xff]  ;;  %v3156_v57 = vld [vmem:[%s4762_s1 + $0x2f8] sm:$0xff] }
 0x589   :  { %v2257_v3 = vsub.f32 %v3155_v52, %v2129_v59  ;;  %v2307_v20 = vsub.f32 %v3156_v57, %v2179_v54  ;;  %v2138_v52 = vmul.f32 0.000125, %v1709_v38  ;;  %v3043_v57 = vpop.f32.mrf.mxu1 }
 0x58b   :  { %2385 = vst [vmem:[%s4765_s4 + $0x168] sm:$0xff] %v2257_v3  ;;  %v2977_v3 = vpop.f32.mrf.mxu0  ;;  %v1939_v6 = vpop.f32.mrf.mxu1 }
 0x58c   :  { %v2141_v56 = vmul.f32 0.000125, %v2977_v3 }
 0x592   :  { %v3157_v60 = vld [vmem:[%s4762_s1 + $0x160] sm:$0xff] }
 0x593   :  { %v2256_v0 = vsub.f32 %v3157_v60, %v2128_v63  ;;  %2435 = vst [vmem:[%s4765_s4 + $0x2f8] sm:$0xff] %v2307_v20  ;;  %v1719_v20 = vpop.f32.mrf.mxu0 }
 0x59a   :  { %v3158_v11 = vld [vmem:[%s4762_s1 + $0x2f0] sm:$0xff] }
 0x59b   :  { %v2306_v34 = vsub.f32 %v3158_v11, %v2178_v50  ;;  %2384 = vst [vmem:[%s4765_s4 + $0x160] sm:$0xff] %v2256_v0  ;;  %v2185_v50 = vmul.f32 0.000125, %v3043_v57  ;;  %v2980_v11 = vpop.f32.mrf.mxu0 }
 0x5a2   :  { %v3159_v4 = vld [vmem:[%s4762_s1 + $0x178] sm:$0xff] }
 0x5a3   :  { %v2259_v7 = vsub.f32 %v3159_v4, %v2131_v5  ;;  %2434 = vst [vmem:[%s4765_s4 + $0x2f0] sm:$0xff] %v2306_v34  ;;  %v2140_v5 = vmul.f32 0.000125, %v1719_v20 }
 0x5a5   :  { %2387 = vst [vmem:[%s4765_s4 + $0x178] sm:$0xff] %v2259_v7  ;;  %v2184_v7 = vmul.f32 0.000125, %v1939_v6 }
 0x5ac   :  { %v3160_v14 = vld [vmem:[%s4762_s1 + $0x170] sm:$0xff] }
 0x5ad   :  { %v2258_v15 = vsub.f32 %v3160_v14, %v2130_v10  ;;  %v2143_v14 = vmul.f32 0.000125, %v2980_v11 }
 0x5af   :  { %2386 = vst [vmem:[%s4765_s4 + $0x170] sm:$0xff] %v2258_v15  ;;  %v1729_v15 = vpop.f32.mrf.mxu0 }
 0x5b6   :  { %v3161_v21 = vld [vmem:[%s4762_s1 + $0x188] sm:$0xff] }
 0x5b7   :  { %v2261_v1 = vsub.f32 %v3161_v21, %v2133_v16  ;;  %v3162_v25 = vld [vmem:[%s4762_s1 + $0x308] sm:$0xff]  ;;  %v2142_v21 = vmul.f32 0.000125, %v1729_v15 }
 0x5b8   :  { %v2309_v61 = vsub.f32 %v3162_v25, %v2181_v19  ;;  %v3046_v25 = vpop.f32.mrf.mxu1 }
 0x5b9   :  { %2389 = vst [vmem:[%s4765_s4 + $0x188] sm:$0xff] %v2261_v1  ;;  %v2983_v1 = vpop.f32.mrf.mxu0 }
 0x5ba   :  { %v2145_v24 = vmul.f32 0.000125, %v2983_v1  ;;  %v1949_v8 = vpop.f32.mrf.mxu1 }
 0x5bc   :  { %v3049_v43 = vpop.f32.mrf.mxu1 }
 0x5bd   :  { %v2189_v44 = vmul.f32 0.000125, %v3049_v43 }
 0x5c0   :  { %v3163_v58 = vld [vmem:[%s4762_s1 + $0x180] sm:$0xff] }
 0x5c1   :  { %v2260_v42 = vsub.f32 %v3163_v58, %v2132_v22  ;;  %2437 = vst [vmem:[%s4765_s4 + $0x308] sm:$0xff] %v2309_v61  ;;  %v1739_v61 = vpop.f32.mrf.mxu0 }
 0x5c8   :  { %v3164_v26 = vld [vmem:[%s4762_s1 + $0x300] sm:$0xff] }
 0x5c9   :  { %v2308_v27 = vsub.f32 %v3164_v26, %v2180_v30  ;;  %2388 = vst [vmem:[%s4765_s4 + $0x180] sm:$0xff] %v2260_v42  ;;  %v2187_v30 = vmul.f32 0.000125, %v3046_v25  ;;  %v2986_v26 = vpop.f32.mrf.mxu0 }
 0x5d0   :  { %v3165_v9 = vld [vmem:[%s4762_s1 + $0x198] sm:$0xff] }
 0x5d1   :  { %v2263_v28 = vsub.f32 %v3165_v9, %v2135_v46  ;;  %2436 = vst [vmem:[%s4765_s4 + $0x300] sm:$0xff] %v2308_v27  ;;  %v2144_v46 = vmul.f32 0.000125, %v1739_v61 }
 0x5d3   :  { %2391 = vst [vmem:[%s4765_s4 + $0x198] sm:$0xff] %v2263_v28  ;;  %v2186_v28 = vmul.f32 0.000125, %v1949_v8 }
 0x5da   :  { %v3166_v31 = vld [vmem:[%s4762_s1 + $0x190] sm:$0xff] }
 0x5db   :  { %v2262_v32 = vsub.f32 %v3166_v31, %v2134_v29  ;;  %v2147_v31 = vmul.f32 0.000125, %v2986_v26 }
 0x5dd   :  { %2390 = vst [vmem:[%s4765_s4 + $0x190] sm:$0xff] %v2262_v32  ;;  %v1749_v32 = vpop.f32.mrf.mxu0 }
 0x5e4   :  { %v3167_v39 = vld [vmem:[%s4762_s1 + $0x1a8] sm:$0xff]  ;;  %v3168_v45 = vld [vmem:[%s4762_s1 + $0x318] sm:$0xff] }
 0x5e5   :  { %v2265_v40 = vsub.f32 %v3167_v39, %v2137_v33  ;;  %v2311_v47 = vsub.f32 %v3168_v45, %v2183_v37  ;;  %v2146_v39 = vmul.f32 0.000125, %v1749_v32  ;;  %v1959_v45 = vpop.f32.mrf.mxu1 }
 0x5e7   :  { %2393 = vst [vmem:[%s4765_s4 + $0x1a8] sm:$0xff] %v2265_v40  ;;  %v3052_v38 = vpop.f32.mrf.mxu1 }
 0x5ee   :  { %v3169_v51 = vld [vmem:[%s4762_s1 + $0x1a0] sm:$0xff] }
 0x5ef   :  { %v2264_v53 = vsub.f32 %v3169_v51, %v2136_v41  ;;  %2439 = vst [vmem:[%s4765_s4 + $0x318] sm:$0xff] %v2311_v47  ;;  %v2188_v51 = vmul.f32 0.000125, %v1959_v45 }
 0x5f6   :  { %v3170_v59 = vld [vmem:[%s4762_s1 + $0x310] sm:$0xff] }
 0x5f7   :  { %v2310_v48 = vsub.f32 %v3170_v59, %v2182_v49  ;;  %2392 = vst [vmem:[%s4765_s4 + $0x1a0] sm:$0xff] %v2264_v53  ;;  %v2191_v59 = vmul.f32 0.000125, %v3052_v38 }
 0x5fe   :  { %v3171_v62 = vld [vmem:[%s4762_s1 + $0x1b8] sm:$0xff] }
 0x5ff   :  { %v2267_v54 = vsub.f32 %v3171_v62, %v2139_v13  ;;  %2438 = vst [vmem:[%s4765_s4 + $0x310] sm:$0xff] %v2310_v48  ;;  %v1969_v48 = vpop.f32.mrf.mxu1 }
 0x601   :  { %2395 = vst [vmem:[%s4765_s4 + $0x1b8] sm:$0xff] %v2267_v54 }
 0x608   :  { %v3172_v63 = vld [vmem:[%s4762_s1 + $0x1b0] sm:$0xff] }
 0x609   :  { %v2266_v55 = vsub.f32 %v3172_v63, %v2138_v52  ;;  %v2190_v52 = vmul.f32 0.000125, %v1969_v48 }
 0x60b   :  { %2394 = vst [vmem:[%s4765_s4 + $0x1b0] sm:$0xff] %v2266_v55  ;;  %v3055_v55 = vpop.f32.mrf.mxu1 }
 0x60d   :  { %v1979_v57 = vpop.f32.mrf.mxu1 }
 0x60f   :  { %v3058_v6 = vpop.f32.mrf.mxu1 }
 0x610   :  { %v2195_v11 = vmul.f32 0.000125, %v3058_v6 }
 0x612   :  { %v3173_v60 = vld [vmem:[%s4762_s1 + $0x1c8] sm:$0xff] }
 0x613   :  { %v2269_v0 = vsub.f32 %v3173_v60, %v2141_v56  ;;  %v3174_v34 = vld [vmem:[%s4762_s1 + $0x328] sm:$0xff]  ;;  %v2193_v56 = vmul.f32 0.000125, %v3055_v55  ;;  %v2192_v60 = vmul.f32 0.000125, %v1979_v57 }
 0x614   :  { %v2313_v4 = vsub.f32 %v3174_v34, %v2185_v50  ;;  %v1989_v34 = vpop.f32.mrf.mxu1 }
 0x615   :  { %2397 = vst [vmem:[%s4765_s4 + $0x1c8] sm:$0xff] %v2269_v0 }
 0x616   :  { %v3061_v15 = vpop.f32.mrf.mxu1 }
 0x61c   :  { %v3175_v10 = vld [vmem:[%s4762_s1 + $0x1c0] sm:$0xff] }
 0x61d   :  { %v2268_v12 = vsub.f32 %v3175_v10, %v2140_v5  ;;  %2441 = vst [vmem:[%s4765_s4 + $0x328] sm:$0xff] %v2313_v4  ;;  %v2194_v10 = vmul.f32 0.000125, %v1989_v34 }
 0x624   :  { %v3176_v16 = vld [vmem:[%s4762_s1 + $0x320] sm:$0xff] }
 0x625   :  { %v2312_v17 = vsub.f32 %v3176_v16, %v2184_v7  ;;  %2396 = vst [vmem:[%s4765_s4 + $0x1c0] sm:$0xff] %v2268_v12  ;;  %v2197_v16 = vmul.f32 0.000125, %v3061_v15 }
 0x62c   :  { %v3177_v18 = vld [vmem:[%s4762_s1 + $0x1d8] sm:$0xff] }
 0x62d   :  { %v2271_v19 = vsub.f32 %v3177_v18, %v2143_v14  ;;  %2440 = vst [vmem:[%s4765_s4 + $0x320] sm:$0xff] %v2312_v17  ;;  %v1999_v17 = vpop.f32.mrf.mxu1 }
 0x62f   :  { %2399 = vst [vmem:[%s4765_s4 + $0x1d8] sm:$0xff] %v2271_v19 }
 0x636   :  { %v3178_v22 = vld [vmem:[%s4762_s1 + $0x1d0] sm:$0xff] }
 0x637   :  { %v2270_v23 = vsub.f32 %v3178_v22, %v2142_v21  ;;  %v2196_v21 = vmul.f32 0.000125, %v1999_v17 }
 0x639   :  { %2398 = vst [vmem:[%s4765_s4 + $0x1d0] sm:$0xff] %v2270_v23  ;;  %v3064_v23 = vpop.f32.mrf.mxu1 }
 0x63b   :  { %v2009_v25 = vpop.f32.mrf.mxu1 }
 0x63d   :  { %v3067_v8 = vpop.f32.mrf.mxu1 }
 0x63e   :  { %v2201_v26 = vmul.f32 0.000125, %v3067_v8 }
 0x640   :  { %v3179_v58 = vld [vmem:[%s4762_s1 + $0x1e8] sm:$0xff]  ;;  %v3180_v27 = vld [vmem:[%s4762_s1 + $0x338] sm:$0xff] }
 0x641   :  { %v2273_v42 = vsub.f32 %v3179_v58, %v2145_v24  ;;  %v2315_v9 = vsub.f32 %v3180_v27, %v2187_v30  ;;  %v2199_v24 = vmul.f32 0.000125, %v3064_v23  ;;  %v2198_v58 = vmul.f32 0.000125, %v2009_v25  ;;  %v2019_v27 = vpop.f32.mrf.mxu1 }
 0x643   :  { %2401 = vst [vmem:[%s4765_s4 + $0x1e8] sm:$0xff] %v2273_v42  ;;  %v3070_v32 = vpop.f32.mrf.mxu1 }
 0x64a   :  { %v3181_v29 = vld [vmem:[%s4762_s1 + $0x1e0] sm:$0xff] }
 0x64b   :  { %v2272_v2 = vsub.f32 %v3181_v29, %v2144_v46  ;;  %2443 = vst [vmem:[%s4765_s4 + $0x338] sm:$0xff] %v2315_v9  ;;  %v2200_v29 = vmul.f32 0.000125, %v2019_v27 }
 0x652   :  { %v3182_v33 = vld [vmem:[%s4762_s1 + $0x330] sm:$0xff] }
 0x653   :  { %v2314_v35 = vsub.f32 %v3182_v33, %v2186_v28  ;;  %2400 = vst [vmem:[%s4765_s4 + $0x1e0] sm:$0xff] %v2272_v2  ;;  %v2203_v33 = vmul.f32 0.000125, %v3070_v32 }
 0x65a   :  { %v3183_v36 = vld [vmem:[%s4762_s1 + $0x1f8] sm:$0xff] }
 0x65b   :  { %v2275_v37 = vsub.f32 %v3183_v36, %v2147_v31  ;;  %2442 = vst [vmem:[%s4765_s4 + $0x330] sm:$0xff] %v2314_v35  ;;  %v2029_v35 = vpop.f32.mrf.mxu1 }
 0x65d   :  { %2403 = vst [vmem:[%s4765_s4 + $0x1f8] sm:$0xff] %v2275_v37  ;;  %v3073_v43 = vpop.f32.mrf.mxu1 }
 0x65f   :  { %v2039_v45 = vpop.f32.mrf.mxu1 }
 0x661   :  { %v3076_v38 = vpop.f32.mrf.mxu1 }
 0x663   :  { %v2049_v48 = vpop.f32.mrf.mxu1 }
 0x664   :  { %v3184_v40 = vld [vmem:[%s4762_s1 + $0x1f0] sm:$0xff] }
 0x665   :  { %v2274_v41 = vsub.f32 %v3184_v40, %v2146_v39  ;;  %v2202_v39 = vmul.f32 0.000125, %v2029_v35  ;;  %v3079_v55 = vpop.f32.mrf.mxu1 }
 0x667   :  { %2402 = vst [vmem:[%s4765_s4 + $0x1f0] sm:$0xff] %v2274_v41  ;;  %v2059_v57 = vpop.f32.mrf.mxu1 }
 0x669   :  { %v3082_v6 = vpop.f32.mrf.mxu1 }
 0x66b   :  { %v2069_v34 = vpop.f32.mrf.mxu1 }
 0x66e   :  { %v3185_v47 = vld [vmem:[%s4762_s1 + $0x348] sm:$0xff] }
 0x66f   :  { %v2317_v49 = vsub.f32 %v3185_v47, %v2189_v44  ;;  %v2205_v44 = vmul.f32 0.000125, %v3073_v43 }
 0x671   :  { %2445 = vst [vmem:[%s4765_s4 + $0x348] sm:$0xff] %v2317_v49 }
 0x678   :  { %v3186_v53 = vld [vmem:[%s4762_s1 + $0x340] sm:$0xff] }
 0x679   :  { %v2316_v13 = vsub.f32 %v3186_v53, %v2188_v51  ;;  %v2204_v51 = vmul.f32 0.000125, %v2039_v45 }
 0x67b   :  { %2444 = vst [vmem:[%s4765_s4 + $0x340] sm:$0xff] %v2316_v13 }
 0x682   :  { %v3187_v62 = vld [vmem:[%s4762_s1 + $0x358] sm:$0xff] }
 0x683   :  { %v2319_v54 = vsub.f32 %v3187_v62, %v2191_v59  ;;  %v2207_v59 = vmul.f32 0.000125, %v3076_v38 }
 0x685   :  { %2447 = vst [vmem:[%s4765_s4 + $0x358] sm:$0xff] %v2319_v54 }
 0x68c   :  { %v3188_v3 = vld [vmem:[%s4762_s1 + $0x350] sm:$0xff] }
 0x68d   :  { %v2318_v63 = vsub.f32 %v3188_v3, %v2190_v52  ;;  %v2206_v52 = vmul.f32 0.000125, %v2049_v48 }
 0x68f   :  { %2446 = vst [vmem:[%s4765_s4 + $0x350] sm:$0xff] %v2318_v63 }
 0x696   :  { %v3189_v20 = vld [vmem:[%s4762_s1 + $0x368] sm:$0xff] }
 0x697   :  { %v2321_v50 = vsub.f32 %v3189_v20, %v2193_v56  ;;  %v2209_v56 = vmul.f32 0.000125, %v3079_v55 }
 0x699   :  { %2449 = vst [vmem:[%s4765_s4 + $0x368] sm:$0xff] %v2321_v50 }
 0x6a0   :  { %v3190_v0 = vld [vmem:[%s4762_s1 + $0x360] sm:$0xff] }
 0x6a1   :  { %v2320_v5 = vsub.f32 %v3190_v0, %v2192_v60  ;;  %v2208_v60 = vmul.f32 0.000125, %v2059_v57 }
 0x6a3   :  { %2448 = vst [vmem:[%s4765_s4 + $0x360] sm:$0xff] %v2320_v5 }
 0x6aa   :  { %v3191_v4 = vld [vmem:[%s4762_s1 + $0x378] sm:$0xff] }
 0x6ab   :  { %v2323_v7 = vsub.f32 %v3191_v4, %v2195_v11  ;;  %v2211_v11 = vmul.f32 0.000125, %v3082_v6 }
 0x6ad   :  { %2451 = vst [vmem:[%s4765_s4 + $0x378] sm:$0xff] %v2323_v7 }
 0x6b4   :  { %v3192_v12 = vld [vmem:[%s4762_s1 + $0x370] sm:$0xff] }
 0x6b5   :  { %v2322_v14 = vsub.f32 %v3192_v12, %v2194_v10  ;;  %v2210_v10 = vmul.f32 0.000125, %v2069_v34 }
 0x6b7   :  { %2450 = vst [vmem:[%s4765_s4 + $0x370] sm:$0xff] %v2322_v14 }
 0x6be   :  { %v3193_v18 = vld [vmem:[%s4762_s1 + $0x388] sm:$0xff] }
 0x6bf   :  { %v2325_v19 = vsub.f32 %v3193_v18, %v2197_v16 }
 0x6c1   :  { %2453 = vst [vmem:[%s4765_s4 + $0x388] sm:$0xff] %v2325_v19 }
 0x6c8   :  { %v3194_v1 = vld [vmem:[%s4762_s1 + $0x380] sm:$0xff] }
 0x6c9   :  { %v2324_v22 = vsub.f32 %v3194_v1, %v2196_v21 }
 0x6cb   :  { %2452 = vst [vmem:[%s4765_s4 + $0x380] sm:$0xff] %v2324_v22 }
 0x6d2   :  { %v3195_v61 = vld [vmem:[%s4762_s1 + $0x398] sm:$0xff] }
 0x6d3   :  { %v2327_v30 = vsub.f32 %v3195_v61, %v2199_v24 }
 0x6d5   :  { %2455 = vst [vmem:[%s4765_s4 + $0x398] sm:$0xff] %v2327_v30 }
 0x6dc   :  { %v3196_v42 = vld [vmem:[%s4762_s1 + $0x390] sm:$0xff] }
 0x6dd   :  { %v2326_v46 = vsub.f32 %v3196_v42, %v2198_v58 }
 0x6df   :  { %2454 = vst [vmem:[%s4765_s4 + $0x390] sm:$0xff] %v2326_v46 }
 0x6e6   :  { %v3197_v9 = vld [vmem:[%s4762_s1 + $0x3a8] sm:$0xff] }
 0x6e7   :  { %v2329_v28 = vsub.f32 %v3197_v9, %v2201_v26 }
 0x6e9   :  { %2457 = vst [vmem:[%s4765_s4 + $0x3a8] sm:$0xff] %v2329_v28 }
 0x6f0   :  { %v3198_v2 = vld [vmem:[%s4762_s1 + $0x3a0] sm:$0xff] }
 0x6f1   :  { %v2328_v31 = vsub.f32 %v3198_v2, %v2200_v29 }
 0x6f3   :  { %2456 = vst [vmem:[%s4765_s4 + $0x3a0] sm:$0xff] %v2328_v31 }
 0x6fa   :  { %v3199_v36 = vld [vmem:[%s4762_s1 + $0x3b8] sm:$0xff] }
 0x6fb   :  { %v2331_v37 = vsub.f32 %v3199_v36, %v2203_v33 }
 0x6fd   :  { %2459 = vst [vmem:[%s4765_s4 + $0x3b8] sm:$0xff] %v2331_v37 }
 0x704   :  { %v3200_v40 = vld [vmem:[%s4762_s1 + $0x3b0] sm:$0xff] }
 0x705   :  { %v2330_v41 = vsub.f32 %v3200_v40, %v2202_v39 }
 0x707   :  { %2458 = vst [vmem:[%s4765_s4 + $0x3b0] sm:$0xff] %v2330_v41 }
 0x70e   :  { %v3201_v47 = vld [vmem:[%s4762_s1 + $0x3c8] sm:$0xff] }
 0x70f   :  { %v2333_v49 = vsub.f32 %v3201_v47, %v2205_v44 }
 0x711   :  { %2461 = vst [vmem:[%s4765_s4 + $0x3c8] sm:$0xff] %v2333_v49 }
 0x718   :  { %v3202_v53 = vld [vmem:[%s4762_s1 + $0x3c0] sm:$0xff] }
 0x719   :  { %v2332_v13 = vsub.f32 %v3202_v53, %v2204_v51 }
 0x71b   :  { %2460 = vst [vmem:[%s4765_s4 + $0x3c0] sm:$0xff] %v2332_v13 }
 0x722   :  { %v3203_v62 = vld [vmem:[%s4762_s1 + $0x3d8] sm:$0xff] }
 0x723   :  { %v2335_v54 = vsub.f32 %v3203_v62, %v2207_v59 }
 0x725   :  { %2463 = vst [vmem:[%s4765_s4 + $0x3d8] sm:$0xff] %v2335_v54 }
 0x72c   :  { %v3204_v3 = vld [vmem:[%s4762_s1 + $0x3d0] sm:$0xff] }
 0x72d   :  { %v2334_v63 = vsub.f32 %v3204_v3, %v2206_v52 }
 0x72f   :  { %2462 = vst [vmem:[%s4765_s4 + $0x3d0] sm:$0xff] %v2334_v63 }
 0x736   :  { %v3205_v20 = vld [vmem:[%s4762_s1 + $0x3e8] sm:$0xff] }
 0x737   :  { %v2337_v50 = vsub.f32 %v3205_v20, %v2209_v56 }
 0x739   :  { %2465 = vst [vmem:[%s4765_s4 + $0x3e8] sm:$0xff] %v2337_v50 }
 0x740   :  { %v3206_v0 = vld [vmem:[%s4762_s1 + $0x3e0] sm:$0xff] }
 0x741   :  { %v2336_v5 = vsub.f32 %v3206_v0, %v2208_v60 }
 0x743   :  { %2464 = vst [vmem:[%s4765_s4 + $0x3e0] sm:$0xff] %v2336_v5 }
 0x74a   :  { %v3207_v4 = vld [vmem:[%s4762_s1 + $0x3f8] sm:$0xff] }
 0x74b   :  { %v2339_v7 = vsub.f32 %v3207_v4, %v2211_v11 }
 0x74d   :  { %2467 = vst [vmem:[%s4765_s4 + $0x3f8] sm:$0xff] %v2339_v7 }
 0x754   :  { %v3208_v12 = vld [vmem:[%s4762_s1 + $0x3f0] sm:$0xff] }
 0x755   :  { %v2338_v14 = vsub.f32 %v3208_v12, %v2210_v10 }
 0x757   :  { %2466 = vst [vmem:[%s4765_s4 + $0x3f0] sm:$0xff] %v2338_v14 }
 0x758   :  { %3217 = dma.done.wait [#allocation3], 16  }
 0x759   :  { %3218 = vsyncadd [#allocation3], 4294967280 }
 0x75a   :  { %2490 = sfence }
 0x75b   :  { %2491 = vsyncpa [#allocation3], 1 }

</bundles_post_ra>
